<compile_context>
chip_gen: v5e
topology: v5e:2x2
jax: 0.10.0
libtpu: 0.0.40
codegen_flags: <defaults>
</compile_context>

<pallas_src>
import jax
import jax.numpy as jnp
from jax.experimental import pallas as pl
from jax.experimental.pallas import tpu as pltpu


# Geometry implied by the PyTorch module (in_features = 86528 = 512 * 13 * 13).
CIN = 3
COUT = 512
KH = KW = 3
OH = OW = 13
SPATIAL = OH * OW            # 169
NUM_CLASSES = 5
K_CONV = CIN * KH * KW       # 27
K_CONV_PAD = 32              # pad im2col depth 27 -> 32 (sublane aligned, zero-padded)
TILE_C = 128                 # COUT chunk streamed per grid step (512 / 128 = 4 chunks)


# ------------------------------ Pallas kernel ------------------------------

def fused_forward_kernel(patches_ref, convw_ref, convb_ref, fcw_ref, o_ref):
    """One (batch element, COUT chunk) step of conv+bias+ReLU+flatten+Linear.

    patches_ref: (1, K_CONV_PAD, SPATIAL)  bf16  im2col patches of this sample
    convw_ref:   (TILE_C, K_CONV_PAD)      bf16  conv weight chunk (K zero-padded)
    convb_ref:   (TILE_C, 1)               f32   conv bias chunk
    fcw_ref:     (NUM_CLASSES, TILE_C, SPATIAL) bf16  fc weight chunk
                 (free reshape of (5, 86528) -> flatten order preserved)
    o_ref:       (1, NUM_CLASSES, 1)       f32   per-sample class logits (accumulator;
                 fc bias is added in the wrapper)
    """
    c = pl.program_id(1)

    @pl.when(c == 0)
    def _():
        o_ref[...] = jnp.zeros_like(o_ref)

    # Conv chunk as one MXU matmul: (TILE_C, K) @ (K, SPATIAL), bf16 in / f32 acc,
    # fused bias + ReLU.  Result stays register/VMEM-value resident (~32 vregs);
    # no scratch round-trip.  It is already in PyTorch flatten order
    # (Cout major, spatial minor).
    feat = jnp.dot(convw_ref[...], patches_ref[0],
                   preferred_element_type=jnp.float32)          # (TILE_C, SPATIAL) f32
    feat = jnp.maximum(feat + convb_ref[...], 0.0)

    # Partial Linear(86528 -> 5) for this COUT chunk: the long reduction is
    # lane-dense for both operands.  Reduce over the TILE_C (sublane) axis first
    # (mostly plain VPU vreg adds), then one small cross-lane reduce over SPATIAL.
    prod = fcw_ref[...].astype(jnp.float32) * feat[None, :, :]  # (N, TILE_C, SPATIAL)
    partial = jnp.sum(prod, axis=1)                             # (N, SPATIAL)
    partial = jnp.sum(partial, axis=-1, keepdims=True)          # (N, 1)
    o_ref[...] += partial[None, :, :]                           # (1, N, 1)


# ------------------------------ JAX wrappers --------------------------------

def _im2col_nchw(x, kh, kw):
    """x: (B, C, H, W) -> (B, C*kh*kw, OH*OW); K ordered (C, kh, kw) like PyTorch."""
    B, C, H, W = x.shape
    oh, ow = H - kh + 1, W - kw + 1
    cols = []
    for i in range(kh):
        for j in range(kw):
            cols.append(x[:, :, i:i + oh, j:j + ow])       # (B, C, oh, ow)
    p = jnp.stack(cols, axis=2)                            # (B, C, kh*kw, oh, ow)
    return p.reshape(B, C * kh * kw, oh * ow)              # (B, 27, 169)


def classification_forward(x, params):
    """features(x) -> flatten -> Dropout(identity, eval) -> Linear(86528, 5)."""
    B = x.shape[0]
    conv_w, conv_b = params["conv_w"], params["conv_b"]
    fc_w, fc_b = params["fc_w"], params["fc_b"]

    # im2col patches; zero-pad the contraction depth 27 -> 32 on both operands
    # (padded terms contribute exactly zero).  bf16 operands, f32 accumulation.
    patches = _im2col_nchw(x, KH, KW)                                       # (B, 27, 169)
    patches = jnp.pad(patches, ((0, 0), (0, K_CONV_PAD - K_CONV), (0, 0)))  # (B, 32, 169)
    patches = patches.astype(jnp.bfloat16)
    w_mat = jnp.pad(conv_w.reshape(COUT, K_CONV),
                    ((0, 0), (0, K_CONV_PAD - K_CONV))).astype(jnp.bfloat16)  # (512, 32)
    b_mat = conv_b.reshape(COUT, 1)                                           # (512, 1) f32
    # Free reshape (no transpose): (5, 86528) -> (5, 512, 169), matching .view(B, -1).
    fcw3 = fc_w.reshape(NUM_CLASSES, COUT, SPATIAL).astype(jnp.bfloat16)

    num_chunks = COUT // TILE_C
    out3 = pl.pallas_call(
        fused_forward_kernel,
        out_shape=jax.ShapeDtypeStruct((B, NUM_CLASSES, 1), jnp.float32),
        grid_spec=pltpu.PrefetchScalarGridSpec(
            num_scalar_prefetch=0,
            grid=(B, num_chunks),
            in_specs=[
                pl.BlockSpec((1, K_CONV_PAD, SPATIAL), lambda b, c: (b, 0, 0)),
                pl.BlockSpec((TILE_C, K_CONV_PAD), lambda b, c: (c, 0)),
                pl.BlockSpec((TILE_C, 1), lambda b, c: (c, 0)),
                pl.BlockSpec((NUM_CLASSES, TILE_C, SPATIAL), lambda b, c: (0, c, 0)),
            ],
            out_specs=pl.BlockSpec((1, NUM_CLASSES, 1), lambda b, c: (b, 0, 0)),
        ),
        compiler_params=pltpu.CompilerParams(
            dimension_semantics=("parallel", "arbitrary")),
    )(patches, w_mat, b_mat, fcw3)

    # Dropout(p=0.75) is identity in eval mode; fc bias folded here (tiny (B, 5) add).
    # TODO(synk): training-mode stochastic dropout (pltpu.prng_*) not emitted.
    return out3[:, :, 0] + fc_b[None, :]


# --------------------------------- main --------------------------------------

if __name__ == "__main__":
    key = jax.random.PRNGKey(0)
    k_x, k_cw, k_cb, k_fw, k_fb = jax.random.split(key, 5)

    B, HIN, WIN = 2, 15, 15                    # -> feature map 512 x 13 x 13
    IN_FEATURES = COUT * OH * OW               # 86528, as in the module

    x = jax.random.normal(k_x, (B, CIN, HIN, WIN), dtype=jnp.float32)

    params = {
        "conv_w": jax.random.normal(k_cw, (COUT, CIN, KH, KW), jnp.float32) * 0.05,
        "conv_b": jax.random.normal(k_cb, (COUT,), jnp.float32) * 0.05,
        "fc_w":   jax.random.normal(k_fw, (NUM_CLASSES, IN_FEATURES), jnp.float32) * 0.01,
        "fc_b":   jax.random.normal(k_fb, (NUM_CLASSES,), jnp.float32) * 0.01,
    }

    out = jax.jit(classification_forward)(x, params)
    out = jax.block_until_ready(out)
    assert out.shape == (B, NUM_CLASSES), out.shape

    # Pure-JAX f32 reference check of the same forward pass (kernel uses bf16
    # operands with f32 accumulation, hence the relaxed tolerance).
    feat_ref = jax.lax.conv_general_dilated(
        x, params["conv_w"], window_strides=(1, 1), padding="VALID",
        dimension_numbers=("NCHW", "OIHW", "NCHW"))
    feat_ref = jnp.maximum(feat_ref + params["conv_b"][None, :, None, None], 0.0)
    ref = feat_ref.reshape(B, -1) @ params["fc_w"].T + params["fc_b"]
    assert jnp.allclose(out, ref, atol=2e-2, rtol=2e-2), \
        float(jnp.max(jnp.abs(out - ref)))

    print("KERNEL_OK")
</pallas_src>

<mosaic_0001>
module attributes {stable_mosaic.version = 11 : i64} {
  func.func @fused_forward_kernel(%arg0: i32, %arg1: i32, %arg2: memref<1x32x169xbf16, #tpu.memory_space<vmem>>, %arg3: memref<128x32xbf16, #tpu.memory_space<vmem>>, %arg4: memref<128x1xf32, #tpu.memory_space<vmem>>, %arg5: memref<5x128x169xbf16, #tpu.memory_space<vmem>>, %arg6: memref<1x5x1xf32, #tpu.memory_space<vmem>>) attributes {dimension_semantics = [#tpu.dimension_semantics<parallel>, #tpu.dimension_semantics<arbitrary>], iteration_bounds = array<i64: 2, 4>, scalar_prefetch = 0 : i64, scratch_operands = 0 : i64, tpu.core_type = #tpu.core_type<tc>, window_params = [{transform_indices = @transform_0, window_bounds = array<i64: 1, 32, 169>}, {transform_indices = @transform_1, window_bounds = array<i64: 128, 32>}, {transform_indices = @transform_2, window_bounds = array<i64: 128, 1>}, {transform_indices = @transform_3, window_bounds = array<i64: 5, 128, 169>}, {transform_indices = @transform_4, window_bounds = array<i64: 1, 5, 1>}]} {
    %c0_i32 = arith.constant 0 : i32
    %0 = arith.cmpi eq, %arg1, %c0_i32 : i32
    %1 = arith.extui %0 : i1 to i32
    %c0_i32_0 = arith.constant 0 : i32
    %2 = arith.cmpi ne, %1, %c0_i32_0 : i32
    scf.if %2 {
      %cst_19 = arith.constant 0.000000e+00 : f32
      %24 = vector.broadcast %cst_19 : f32 to vector<1x5x1xf32>
      %c0_20 = arith.constant 0 : index
      %c0_21 = arith.constant 0 : index
      %c0_22 = arith.constant 0 : index
      %25 = vector.load %arg6[%c0_20, %c0_21, %c0_22] : memref<1x5x1xf32, #tpu.memory_space<vmem>>, vector<1x5x1xf32>
      tpu.vector_store %arg6[%c0_20, %c0_21, %c0_22], %24 {strides = array<i32>} : memref<1x5x1xf32, #tpu.memory_space<vmem>>, vector<1x5x1xf32>,
    } else {
    }
    %c0 = arith.constant 0 : index
    %c0_1 = arith.constant 0 : index
    %3 = vector.load %arg3[%c0, %c0_1] : memref<128x32xbf16, #tpu.memory_space<vmem>>, vector<128x32xbf16>
    %c0_2 = arith.constant 0 : index
    %c0_3 = arith.constant 0 : index
    %c0_4 = arith.constant 0 : index
    %4 = vector.load %arg2[%c0_2, %c0_3, %c0_4] : memref<1x32x169xbf16, #tpu.memory_space<vmem>>, vector<1x32x169xbf16>
    %5 = vector.shape_cast %4 : vector<1x32x169xbf16> to vector<32x169xbf16>
    %cst = arith.constant dense<0.000000e+00> : vector<128x169xf32>
    %6 = tpu.matmul %3, %5, %cst {dimension_numbers = #tpu.dot_dimension_numbers<[1], [0], [0], [1], [0, 0, 1, 1], [], []>} : vector<128x32xbf16>, vector<32x169xbf16>, vector<128x169xf32> -> vector<128x169xf32>
    %c0_5 = arith.constant 0 : index
    %c0_6 = arith.constant 0 : index
    %7 = vector.load %arg4[%c0_5, %c0_6] : memref<128x1xf32, #tpu.memory_space<vmem>>, vector<128x1xf32>
    %8 = vector.broadcast %7 : vector<128x1xf32> to vector<128x169xf32>
    %9 = arith.addf %6, %8 : vector<128x169xf32>
    %cst_7 = arith.constant 0.000000e+00 : f32
    %10 = vector.broadcast %cst_7 : f32 to vector<128x169xf32>
    %11 = arith.maximumf %9, %10 : vector<128x169xf32>
    %c0_8 = arith.constant 0 : index
    %c0_9 = arith.constant 0 : index
    %c0_10 = arith.constant 0 : index
    %12 = vector.load %arg5[%c0_8, %c0_9, %c0_10] : memref<5x128x169xbf16, #tpu.memory_space<vmem>>, vector<5x128x169xbf16>
    %13 = arith.extf %12 : vector<5x128x169xbf16> to vector<5x128x169xf32>
    %14 = vector.shape_cast %11 : vector<128x169xf32> to vector<1x128x169xf32>
    %15 = vector.broadcast %14 : vector<1x128x169xf32> to vector<5x128x169xf32>
    %16 = arith.mulf %13, %15 : vector<5x128x169xf32>
    %cst_11 = arith.constant dense<0.000000e+00> : vector<5x169xf32>
    %17 = vector.multi_reduction <add>, %16, %cst_11 [1] : vector<5x128x169xf32> to vector<5x169xf32>
    %cst_12 = arith.constant dense<0.000000e+00> : vector<5xf32>
    %18 = vector.multi_reduction <add>, %17, %cst_12 [1] : vector<5x169xf32> to vector<5xf32>
    %19 = vector.shape_cast %18 : vector<5xf32> to vector<5x1xf32>
    %c0_13 = arith.constant 0 : index
    %c0_14 = arith.constant 0 : index
    %c0_15 = arith.constant 0 : index
    %20 = vector.load %arg6[%c0_13, %c0_14, %c0_15] : memref<1x5x1xf32, #tpu.memory_space<vmem>>, vector<1x5x1xf32>
    %21 = vector.shape_cast %19 : vector<5x1xf32> to vector<1x5x1xf32>
    %22 = arith.addf %20, %21 : vector<1x5x1xf32>
    %c0_16 = arith.constant 0 : index
    %c0_17 = arith.constant 0 : index
    %c0_18 = arith.constant 0 : index
    %23 = vector.load %arg6[%c0_16, %c0_17, %c0_18] : memref<1x5x1xf32, #tpu.memory_space<vmem>>, vector<1x5x1xf32>
    tpu.vector_store %arg6[%c0_16, %c0_17, %c0_18], %22 {strides = array<i32>} : memref<1x5x1xf32, #tpu.memory_space<vmem>>, vector<1x5x1xf32>,
    return
  }
  func.func @transform_0(%arg0: i32, %arg1: i32) -> (i32, i32, i32) {
    %c0_i32 = arith.constant 0 : i32
    %c0_i32_0 = arith.constant 0 : i32
    %c0_i32_1 = arith.constant 0 : i32
    return %arg0, %c0_i32, %c0_i32_0 : i32, i32, i32
  }
  func.func @transform_1(%arg0: i32, %arg1: i32) -> (i32, i32) {
    %c0_i32 = arith.constant 0 : i32
    %c0_i32_0 = arith.constant 0 : i32
    return %arg1, %c0_i32 : i32, i32
  }
  func.func @transform_2(%arg0: i32, %arg1: i32) -> (i32, i32) {
    %c0_i32 = arith.constant 0 : i32
    %c0_i32_0 = arith.constant 0 : i32
    return %arg1, %c0_i32 : i32, i32
  }
  func.func @transform_3(%arg0: i32, %arg1: i32) -> (i32, i32, i32) {
    %c0_i32 = arith.constant 0 : i32
    %c0_i32_0 = arith.constant 0 : i32
    %c0_i32_1 = arith.constant 0 : i32
    return %c0_i32, %arg1, %c0_i32_0 : i32, i32, i32
  }
  func.func @transform_4(%arg0: i32, %arg1: i32) -> (i32, i32, i32) {
    %c0_i32 = arith.constant 0 : i32
    %c0_i32_0 = arith.constant 0 : i32
    %c0_i32_1 = arith.constant 0 : i32
    return %arg0, %c0_i32, %c0_i32_0 : i32, i32, i32
  }
}

</mosaic_0001>

<bundles_post_ra>
// kernel: classification_forward.1
= control target key start
LH: loop header
LB: loop body
LE: loop exit
PB: predicated region body
PF: predicated region fallthrough
CT: control target
= control target key end

     0   :  { %s2043_s15 = smov 0   ;;  %s2045_s16 = smov 0   ;;  %s3196_s0 = inlined_call_operand.vmem [shape: bf16[2,32,169], index: 0, kind: input, shape index: {}]   ;;  %s3197_s1 = inlined_call_operand.vmem [shape: bf16[512,32], index: 1, kind: input, shape index: {}]   ;;  %s3198_s2 = inlined_call_operand.vmem [shape: f32[512,1], index: 2, kind: input, shape index: {}]   ;;  %s3199_s3 = inlined_call_operand.vmem [shape: bf16[5,512,169], index: 3, kind: input, shape index: {}]   ;;  %s3200_s4 = inlined_call_operand.vmem [shape: f32[2,5,1], index: 4, kind: output, shape index: {}]  }
   0x1   :  { %s2047_s17 = smov 0   ;;  %s2049_s18 = smov 0  }
   0x2   :  { %s2051_s19 = smov 0   ;;  %s2053_s20 = smov 0  }
   0x3   :  { %s2055_s21 = smov 0  }
   0x4 LB: > { %s23_s22 = sadd.s32 1, %s2006_s19  ;;  %s26_s23 = sadd.s32 1, %s2010_s20  ;;  %s2014_s21 = sphi %s2055_s21, %s14_s21   ;;  %s2010_s20 = sphi %s2053_s20, %s3341_s20   ;;  %s2006_s19 = sphi %s2051_s19, %s3340_s19   ;;  %s2002_s18 = sphi %s2049_s18, %s3339_s18   ;;  %s1998_s17 = sphi %s2047_s17, %s3338_s17   ;;  %s1994_s16 = sphi %s2045_s16, %s3337_s16   ;;  %s1990_s15 = sphi %s2043_s15, %s3336_s15  }
   0x5   : > { %p24_p0 = scmp.ge.s32.totalorder %s23_s22, 4  ;;  %s111_s24 = sadd.s32 1, %s1994_s16 }
   0x6   : > { %p118_p1 = scmp.ne.s32.totalorder %s1994_s16, %s1990_s15  ;;  %p119_p2 = scmp.eq.s32.totalorder %s2014_s21, 0 }
   0x7   : > { %s3343_s22 = smov (%p24_p0, %s23_s22), 0  ;;  %s3345_s23 = smov (!%p24_p0, %s26_s23), %s2010_s20 }
   0x8   : > { %s108_s25 = ssub.s32 %s2006_s19, %s3343_s22  ;;  %p120_p3 = por %p119_p2, %p118_p1 }
   0x9   : > { %p28_p4 = scmp.ge.s32.totalorder %s3345_s23, 2  ;;  %p109_p5 = scmp.eq.s32.totalorder %s108_s25, 0 }
   0xa   : > { %p1799_p6 = scmp.ge.s32.totalorder %s2014_s21, 8 }
   0xb   : > { %s3347_s23 = smov (%p28_p4, %s3345_s23), 0 }
   0xc   : > { %s2092_s26 = scalar_select %p109_p5, %s1994_s16, %s111_s24  }
   0xd   : > { %170 = sbr.rel (%p1799_p6) target bundleno = 102 (0x66), region = 16 }
  0x12   : > { %199 = sbr.rel (!%p120_p3) target bundleno = 102 (0x66), region = 32  ;;  %s201_s27 = sand.u32 (%p120_p3), 1, %s1994_s16  }
  0x13   : > { %s1879_s28 = sshll.u32 (%p120_p3), %s2006_s19, 7  ;;  %s1897_s29 = smul.u32 (%p120_p3), 640, %s201_s27 }
  0x14   : > { %s2100_s6 = scalar_lea.vmem (%p120_p3), %s3199_s3, %s1879_s28 }
  0x15   : > { %v394_v0 = vld [vmem:[%s2100_s6] sm:$0xff] (%p120_p3)  ;;  %v396_v1 = vld [vmem:[%s2100_s6 + $0x8] sm:$0xff] (%p120_p3)  ;;  %v398_v2 = vld [vmem:[%s2100_s6 + $0x10] sm:$0xff] (%p120_p3)  ;;  %s2105_s7 = scalar_lea.vmem (%p120_p3), [#allocation2], %s1897_s29 }
  0x16   : > { %395 = vst [vmem:[%s2105_s7] sm:$0xff] (%p120_p3), %v394_v0  ;;  %v400_v3 = vld [vmem:[%s2100_s6 + $0x18] sm:$0xff] (%p120_p3)  ;;  %v402_v4 = vld [vmem:[%s2100_s6 + $0x20] sm:$0xff] (%p120_p3)  ;;  %v404_v5 = vld [vmem:[%s2100_s6 + $0x28] sm:$0xff] (%p120_p3) }
  0x17   : > { %397 = vst [vmem:[%s2105_s7 + $0x8] sm:$0xff] %v396_v1  ;;  %v406_v6 = vld [vmem:[%s2100_s6 + $0x30] sm:$0xff]  ;;  %v408_v7 = vld [vmem:[%s2100_s6 + $0x38] sm:$0xff]  ;;  %v410_v8 = vld [vmem:[%s2100_s6 + $0x40] sm:$0xff] }
  0x18   : > { %399 = vst [vmem:[%s2105_s7 + $0x10] sm:$0xff] %v398_v2  ;;  %v412_v9 = vld [vmem:[%s2100_s6 + $0x48] sm:$0xff]  ;;  %v414_v10 = vld [vmem:[%s2100_s6 + $0x50] sm:$0xff]  ;;  %v416_v11 = vld [vmem:[%s2100_s6 + $0x58] sm:$0xff] }
  0x19   : > { %401 = vst [vmem:[%s2105_s7 + $0x18] sm:$0xff] %v400_v3  ;;  %v418_v12 = vld [vmem:[%s2100_s6 + $0x60] sm:$0xff]  ;;  %v420_v13 = vld [vmem:[%s2100_s6 + $0x68] sm:$0xff]  ;;  %v422_v14 = vld [vmem:[%s2100_s6 + $0x70] sm:$0xff] }
  0x1a   : > { %403 = vst [vmem:[%s2105_s7 + $0x20] sm:$0xff] %v402_v4  ;;  %v424_v15 = vld [vmem:[%s2100_s6 + $0x78] sm:$0xff]  ;;  %v426_v16 = vld [vmem:[%s2100_s6 + $0x200] sm:$0xff]  ;;  %v428_v17 = vld [vmem:[%s2100_s6 + $0x208] sm:$0xff] }
  0x1b   : > { %405 = vst [vmem:[%s2105_s7 + $0x28] sm:$0xff] %v404_v5  ;;  %v430_v18 = vld [vmem:[%s2100_s6 + $0x210] sm:$0xff]  ;;  %v432_v19 = vld [vmem:[%s2100_s6 + $0x218] sm:$0xff]  ;;  %v434_v20 = vld [vmem:[%s2100_s6 + $0x220] sm:$0xff] }
  0x1c   : > { %407 = vst [vmem:[%s2105_s7 + $0x30] sm:$0xff] %v406_v6  ;;  %v436_v21 = vld [vmem:[%s2100_s6 + $0x228] sm:$0xff]  ;;  %v438_v22 = vld [vmem:[%s2100_s6 + $0x230] sm:$0xff]  ;;  %v440_v23 = vld [vmem:[%s2100_s6 + $0x238] sm:$0xff] }
  0x1d   : > { %409 = vst [vmem:[%s2105_s7 + $0x38] sm:$0xff] %v408_v7  ;;  %v442_v24 = vld [vmem:[%s2100_s6 + $0x240] sm:$0xff]  ;;  %v444_v25 = vld [vmem:[%s2100_s6 + $0x248] sm:$0xff]  ;;  %v446_v26 = vld [vmem:[%s2100_s6 + $0x250] sm:$0xff] }
  0x1e   : > { %411 = vst [vmem:[%s2105_s7 + $0x40] sm:$0xff] %v410_v8  ;;  %v448_v27 = vld [vmem:[%s2100_s6 + $0x258] sm:$0xff]  ;;  %v450_v28 = vld [vmem:[%s2100_s6 + $0x260] sm:$0xff]  ;;  %v452_v29 = vld [vmem:[%s2100_s6 + $0x268] sm:$0xff] }
  0x1f   : > { %413 = vst [vmem:[%s2105_s7 + $0x48] sm:$0xff] %v412_v9  ;;  %v454_v30 = vld [vmem:[%s2100_s6 + $0x270] sm:$0xff]  ;;  %v456_v31 = vld [vmem:[%s2100_s6 + $0x278] sm:$0xff]  ;;  %v458_v32 = vld [vmem:[%s2100_s6 + $0x400] sm:$0xff] }
  0x20   : > { %415 = vst [vmem:[%s2105_s7 + $0x50] sm:$0xff] %v414_v10  ;;  %v460_v33 = vld [vmem:[%s2100_s6 + $0x408] sm:$0xff]  ;;  %v462_v34 = vld [vmem:[%s2100_s6 + $0x410] sm:$0xff]  ;;  %v464_v35 = vld [vmem:[%s2100_s6 + $0x418] sm:$0xff] }
  0x21   : > { %417 = vst [vmem:[%s2105_s7 + $0x58] sm:$0xff] %v416_v11  ;;  %v466_v36 = vld [vmem:[%s2100_s6 + $0x420] sm:$0xff]  ;;  %v468_v37 = vld [vmem:[%s2100_s6 + $0x428] sm:$0xff]  ;;  %v470_v38 = vld [vmem:[%s2100_s6 + $0x430] sm:$0xff] }
  0x22   : > { %419 = vst [vmem:[%s2105_s7 + $0x60] sm:$0xff] %v418_v12  ;;  %v472_v39 = vld [vmem:[%s2100_s6 + $0x438] sm:$0xff]  ;;  %v474_v40 = vld [vmem:[%s2100_s6 + $0x440] sm:$0xff]  ;;  %v476_v41 = vld [vmem:[%s2100_s6 + $0x448] sm:$0xff] }
  0x23   : > { %421 = vst [vmem:[%s2105_s7 + $0x68] sm:$0xff] %v420_v13  ;;  %v478_v42 = vld [vmem:[%s2100_s6 + $0x450] sm:$0xff]  ;;  %v480_v43 = vld [vmem:[%s2100_s6 + $0x458] sm:$0xff]  ;;  %v482_v44 = vld [vmem:[%s2100_s6 + $0x460] sm:$0xff] }
  0x24   : > { %423 = vst [vmem:[%s2105_s7 + $0x70] sm:$0xff] %v422_v14  ;;  %v484_v45 = vld [vmem:[%s2100_s6 + $0x468] sm:$0xff]  ;;  %v486_v46 = vld [vmem:[%s2100_s6 + $0x470] sm:$0xff]  ;;  %v488_v47 = vld [vmem:[%s2100_s6 + $0x478] sm:$0xff] }
  0x25   : > { %425 = vst [vmem:[%s2105_s7 + $0x78] sm:$0xff] %v424_v15  ;;  %v490_v48 = vld [vmem:[%s2100_s6 + $0x600] sm:$0xff]  ;;  %v492_v49 = vld [vmem:[%s2100_s6 + $0x608] sm:$0xff]  ;;  %v494_v50 = vld [vmem:[%s2100_s6 + $0x610] sm:$0xff] }
  0x26   : > { %427 = vst [vmem:[%s2105_s7 + $0x80] sm:$0xff] %v426_v16  ;;  %v496_v51 = vld [vmem:[%s2100_s6 + $0x618] sm:$0xff]  ;;  %v498_v52 = vld [vmem:[%s2100_s6 + $0x620] sm:$0xff]  ;;  %v500_v53 = vld [vmem:[%s2100_s6 + $0x628] sm:$0xff] }
  0x27   : > { %429 = vst [vmem:[%s2105_s7 + $0x88] sm:$0xff] %v428_v17  ;;  %v502_v54 = vld [vmem:[%s2100_s6 + $0x630] sm:$0xff]  ;;  %v504_v55 = vld [vmem:[%s2100_s6 + $0x638] sm:$0xff]  ;;  %v506_v56 = vld [vmem:[%s2100_s6 + $0x640] sm:$0xff] }
  0x28   : > { %431 = vst [vmem:[%s2105_s7 + $0x90] sm:$0xff] %v430_v18  ;;  %v508_v57 = vld [vmem:[%s2100_s6 + $0x648] sm:$0xff]  ;;  %v510_v58 = vld [vmem:[%s2100_s6 + $0x650] sm:$0xff]  ;;  %v512_v59 = vld [vmem:[%s2100_s6 + $0x658] sm:$0xff] }
  0x29   : > { %433 = vst [vmem:[%s2105_s7 + $0x98] sm:$0xff] %v432_v19  ;;  %v514_v60 = vld [vmem:[%s2100_s6 + $0x660] sm:$0xff]  ;;  %v516_v61 = vld [vmem:[%s2100_s6 + $0x668] sm:$0xff]  ;;  %v518_v62 = vld [vmem:[%s2100_s6 + $0x670] sm:$0xff] }
  0x2a   : > { %435 = vst [vmem:[%s2105_s7 + $0xa0] sm:$0xff] %v434_v20  ;;  %v520_v63 = vld [vmem:[%s2100_s6 + $0x678] sm:$0xff]  ;;  %v522_v0 = vld [vmem:[%s2100_s6 + $0x800] sm:$0xff]  ;;  %v524_v1 = vld [vmem:[%s2100_s6 + $0x808] sm:$0xff] }
  0x2b   : > { %437 = vst [vmem:[%s2105_s7 + $0xa8] sm:$0xff] %v436_v21  ;;  %v526_v2 = vld [vmem:[%s2100_s6 + $0x810] sm:$0xff]  ;;  %v528_v3 = vld [vmem:[%s2100_s6 + $0x818] sm:$0xff]  ;;  %v530_v4 = vld [vmem:[%s2100_s6 + $0x820] sm:$0xff] }
  0x2c   : > { %439 = vst [vmem:[%s2105_s7 + $0xb0] sm:$0xff] %v438_v22  ;;  %v532_v5 = vld [vmem:[%s2100_s6 + $0x828] sm:$0xff]  ;;  %v534_v6 = vld [vmem:[%s2100_s6 + $0x830] sm:$0xff]  ;;  %v536_v7 = vld [vmem:[%s2100_s6 + $0x838] sm:$0xff] }
  0x2d   : > { %441 = vst [vmem:[%s2105_s7 + $0xb8] sm:$0xff] %v440_v23  ;;  %v538_v8 = vld [vmem:[%s2100_s6 + $0x840] sm:$0xff]  ;;  %v540_v9 = vld [vmem:[%s2100_s6 + $0x848] sm:$0xff]  ;;  %v542_v10 = vld [vmem:[%s2100_s6 + $0x850] sm:$0xff] }
  0x2e   : > { %443 = vst [vmem:[%s2105_s7 + $0xc0] sm:$0xff] %v442_v24  ;;  %v544_v11 = vld [vmem:[%s2100_s6 + $0x858] sm:$0xff]  ;;  %v546_v12 = vld [vmem:[%s2100_s6 + $0x860] sm:$0xff]  ;;  %v548_v13 = vld [vmem:[%s2100_s6 + $0x868] sm:$0xff] }
  0x2f   : > { %445 = vst [vmem:[%s2105_s7 + $0xc8] sm:$0xff] %v444_v25  ;;  %v550_v14 = vld [vmem:[%s2100_s6 + $0x870] sm:$0xff]  ;;  %v552_v15 = vld [vmem:[%s2100_s6 + $0x878] sm:$0xff] }
  0x30   : > { %447 = vst [vmem:[%s2105_s7 + $0xd0] sm:$0xff] %v446_v26 }
  0x31   : > { %449 = vst [vmem:[%s2105_s7 + $0xd8] sm:$0xff] %v448_v27 }
  0x32   : > { %451 = vst [vmem:[%s2105_s7 + $0xe0] sm:$0xff] %v450_v28 }
  0x33   : > { %453 = vst [vmem:[%s2105_s7 + $0xe8] sm:$0xff] %v452_v29 }
  0x34   : > { %455 = vst [vmem:[%s2105_s7 + $0xf0] sm:$0xff] %v454_v30 }
  0x35   : > { %457 = vst [vmem:[%s2105_s7 + $0xf8] sm:$0xff] %v456_v31 }
  0x36   : > { %459 = vst [vmem:[%s2105_s7 + $0x100] sm:$0xff] %v458_v32 }
  0x37   : > { %461 = vst [vmem:[%s2105_s7 + $0x108] sm:$0xff] %v460_v33 }
  0x38   : > { %463 = vst [vmem:[%s2105_s7 + $0x110] sm:$0xff] %v462_v34 }
  0x39   : > { %465 = vst [vmem:[%s2105_s7 + $0x118] sm:$0xff] %v464_v35 }
  0x3a   : > { %467 = vst [vmem:[%s2105_s7 + $0x120] sm:$0xff] %v466_v36 }
  0x3b   : > { %469 = vst [vmem:[%s2105_s7 + $0x128] sm:$0xff] %v468_v37 }
  0x3c   : > { %471 = vst [vmem:[%s2105_s7 + $0x130] sm:$0xff] %v470_v38 }
  0x3d   : > { %473 = vst [vmem:[%s2105_s7 + $0x138] sm:$0xff] %v472_v39 }
  0x3e   : > { %475 = vst [vmem:[%s2105_s7 + $0x140] sm:$0xff] %v474_v40 }
  0x3f   : > { %477 = vst [vmem:[%s2105_s7 + $0x148] sm:$0xff] %v476_v41 }
  0x40   : > { %479 = vst [vmem:[%s2105_s7 + $0x150] sm:$0xff] %v478_v42 }
  0x41   : > { %481 = vst [vmem:[%s2105_s7 + $0x158] sm:$0xff] %v480_v43 }
  0x42   : > { %483 = vst [vmem:[%s2105_s7 + $0x160] sm:$0xff] %v482_v44 }
  0x43   : > { %485 = vst [vmem:[%s2105_s7 + $0x168] sm:$0xff] %v484_v45 }
  0x44   : > { %487 = vst [vmem:[%s2105_s7 + $0x170] sm:$0xff] %v486_v46 }
  0x45   : > { %489 = vst [vmem:[%s2105_s7 + $0x178] sm:$0xff] %v488_v47 }
  0x46   : > { %491 = vst [vmem:[%s2105_s7 + $0x180] sm:$0xff] %v490_v48 }
  0x47   : > { %493 = vst [vmem:[%s2105_s7 + $0x188] sm:$0xff] %v492_v49 }
  0x48   : > { %495 = vst [vmem:[%s2105_s7 + $0x190] sm:$0xff] %v494_v50 }
  0x49   : > { %497 = vst [vmem:[%s2105_s7 + $0x198] sm:$0xff] %v496_v51 }
  0x4a   : > { %499 = vst [vmem:[%s2105_s7 + $0x1a0] sm:$0xff] %v498_v52 }
  0x4b   : > { %501 = vst [vmem:[%s2105_s7 + $0x1a8] sm:$0xff] %v500_v53 }
  0x4c   : > { %503 = vst [vmem:[%s2105_s7 + $0x1b0] sm:$0xff] %v502_v54 }
  0x4d   : > { %505 = vst [vmem:[%s2105_s7 + $0x1b8] sm:$0xff] %v504_v55 }
  0x4e   : > { %507 = vst [vmem:[%s2105_s7 + $0x1c0] sm:$0xff] %v506_v56 }
  0x4f   : > { %509 = vst [vmem:[%s2105_s7 + $0x1c8] sm:$0xff] %v508_v57 }
  0x50   : > { %511 = vst [vmem:[%s2105_s7 + $0x1d0] sm:$0xff] %v510_v58 }
  0x51   : > { %513 = vst [vmem:[%s2105_s7 + $0x1d8] sm:$0xff] %v512_v59 }
  0x52   : > { %515 = vst [vmem:[%s2105_s7 + $0x1e0] sm:$0xff] %v514_v60 }
  0x53   : > { %517 = vst [vmem:[%s2105_s7 + $0x1e8] sm:$0xff] %v516_v61 }
  0x54   : > { %519 = vst [vmem:[%s2105_s7 + $0x1f0] sm:$0xff] %v518_v62 }
  0x55   : > { %521 = vst [vmem:[%s2105_s7 + $0x1f8] sm:$0xff] %v520_v63 }
  0x56   : > { %523 = vst [vmem:[%s2105_s7 + $0x200] sm:$0xff] %v522_v0 }
  0x57   : > { %525 = vst [vmem:[%s2105_s7 + $0x208] sm:$0xff] %v524_v1 }
  0x58   : > { %527 = vst [vmem:[%s2105_s7 + $0x210] sm:$0xff] %v526_v2 }
  0x59   : > { %529 = vst [vmem:[%s2105_s7 + $0x218] sm:$0xff] %v528_v3 }
  0x5a   : > { %531 = vst [vmem:[%s2105_s7 + $0x220] sm:$0xff] %v530_v4 }
  0x5b   : > { %533 = vst [vmem:[%s2105_s7 + $0x228] sm:$0xff] %v532_v5 }
  0x5c   : > { %535 = vst [vmem:[%s2105_s7 + $0x230] sm:$0xff] %v534_v6 }
  0x5d   : > { %537 = vst [vmem:[%s2105_s7 + $0x238] sm:$0xff] %v536_v7 }
  0x5e   : > { %539 = vst [vmem:[%s2105_s7 + $0x240] sm:$0xff] %v538_v8 }
  0x5f   : > { %541 = vst [vmem:[%s2105_s7 + $0x248] sm:$0xff] %v540_v9 }
  0x60   : > { %543 = vst [vmem:[%s2105_s7 + $0x250] sm:$0xff] %v542_v10 }
  0x61   : > { %545 = vst [vmem:[%s2105_s7 + $0x258] sm:$0xff] %v544_v11 }
  0x62   : > { %547 = vst [vmem:[%s2105_s7 + $0x260] sm:$0xff] %v546_v12 }
  0x63   : > { %549 = vst [vmem:[%s2105_s7 + $0x268] sm:$0xff] %v548_v13 }
  0x64   : > { %551 = vst [vmem:[%s2105_s7 + $0x270] sm:$0xff] %v550_v14 }
  0x65   : > { %553 = vst [vmem:[%s2105_s7 + $0x278] sm:$0xff] %v552_v15 }
  0x66 PF: > { %p1803_p7 = scmp.ge.s32.totalorder %s2014_s21, 1  ;;  %p558_p8 = scmp.lt.s32.totalorder %s2014_s21, 9 }
  0x68   : > { %p559_p9 = pnand %p1803_p7, %p558_p8 }
  0x6a   : > { %562 = sbr.rel (%p559_p9) target bundleno = 564 (0x234), region = 70 }
  0x6f   : > { %s565_s8 = sand.u32 1, %s1990_s15   ;;  %p604_p10 = scmp.lt.s32.totalorder %s2002_s18, 1 }
  0x70   : > { %s1898_s9 = smul.u32 640, %s565_s8  ;;  %s1806_s10 = sshll.u32 %s1998_s17, 4 }
  0x71   : > { %s3349_s18 = smov (!%p604_p10, %s2002_s18), 1  ;;  %p610_p11 = scmp.lt.s32.totalorder %s1806_s10, 63 }
  0x72   : > { %s1880_s11 = sshll.u32 %s3349_s18, 5  ;;  %s1810_s12 = sshll.u32 %s3349_s18, 3 }
  0x73   : > { %s608_s24 = scalar_lea.vmem %s3196_s0, %s1880_s11  ;;  %s2276_s28 = scalar_lea.vmem %s3200_s4, %s1810_s12 }
  0x74   : > { %s3351_s10 = smov (!%p610_p11, %s1806_s10), 63  ;;  %s2288_s13 = scalar_lea.vmem [#allocation2], %s1898_s9 }
  0x75   : > { %s1807_s29 = sshll.u32 %s3351_s10, 2  ;;  %s1809_s30 = sshll.u32 %s3351_s10, 3 }
  0x76   : > { %s2281_s6 = scalar_lea.vmem %s3197_s1, %s1807_s29  ;;  %s2286_s18 = scalar_lea.vmem %s3198_s2, %s1809_s30 }
  0x77   : > { %p1811_p12 = scmp.ne.s32.totalorder %s1998_s17, 0 }
  0x79   : > { %630 = sbr.rel (%p1811_p12) target bundleno = 128 (0x80), region = 78 }
  0x7e   : > { %vm631_vm0 = vcmask 4096   ;;  %v2016_v16 = vmov 0.0  }
  0x7f   : > { %632 = vst.msk [vmem:[%s2276_s28] sm:$0x1f] %vm631_vm0, %v2016_v16 }
  0x80 PF: > { %v1854_v17 = vld [vmem:[%s608_s24 + $0x10] sm:$0xf]  ;;  %v1892_v18 = vld [vmem:[%s608_s24 + $0x14] sm:$0xf0]  ;;  %v1891_v19 = vld [vmem:[%s608_s24 + $0x14] sm:$0xf] }
  0x81   : > { %v1855_v20 = vor.u32 %v1892_v18, %v1854_v17  ;;  %v1856_v21 = vld [vmem:[%s608_s24 + $0x18] sm:$0xf0]  ;;  %v1846_v22 = vld [vmem:[%s608_s24] sm:$0xf]  ;;  %v1890_v23 = vld [vmem:[%s608_s24 + $0x4] sm:$0xf0] }
  0x82   : > { %v1859_v24 = vor.u32 %v1891_v19, %v1856_v21  ;;  %v1889_v25 = vld [vmem:[%s608_s24 + $0x4] sm:$0xf]  ;;  %v1848_v26 = vld [vmem:[%s608_s24 + $0x8] sm:$0xf0]  ;;  %v1847_v27 = vor.u32 %v1890_v23, %v1846_v22  ;;  %v655_v30 = vld [vmem:[%s2286_s18 + $0x10] sm:$0xff]  ;;  %v2017_v31 = vmov 0  }
  0x83   : > { %840 = vmatpush.bf16.msra.mxu0 %v1855_v20  ;;  %1893 = vmatpush.bf16.msra.mxu2 %v1855_v20  ;;  %v653_v28 = vld [vmem:[%s2286_s18] sm:$0xff]  ;;  %v1851_v29 = vor.u32 %v1889_v25, %v1848_v26  ;;  %vm809_vm1 = vcmask 261120   ;;  %v654_v34 = vld [vmem:[%s2286_s18 + $0x8] sm:$0xff]  ;;  %v656_v35 = vld [vmem:[%s2286_s18 + $0x18] sm:$0xff]  ;;  %vm1385_vm2 = vcmask 334848   ;;  %vm1665_vm3 = vcmask 1041409  }
  0x84   : > { %889 = vmatpush.bf16.msra.mxu1 %v1859_v24  ;;  %1895 = vmatpush.bf16.msra.mxu3 %v1859_v24  ;;  %v1881_v32 = vld [vmem:[%s2281_s6] sm:$0xff]  ;;  %v658_v37 = vld [vmem:[%s2286_s18 + $0x28] sm:$0xff]  ;;  %v659_v38 = vld [vmem:[%s2286_s18 + $0x30] sm:$0xff]  ;;  %vm1667_vm4 = vcmask 1042434   ;;  %vm1669_vm5 = vcmask 1043459   ;;  %vm1671_vm6 = vcmask 1044484  }
  0x85   : > { %1957 = vset.pattern.permute.xlu0 %v2017_v31  ;;  %1958 = vset.pattern.permute.xlu1 %v2017_v31  ;;  %v1885_v33 = vld [vmem:[%s2281_s6 + $0x20] sm:$0xff]  ;;  %v660_v39 = vld [vmem:[%s2286_s18 + $0x38] sm:$0xff]  ;;  %v1882_v40 = vld [vmem:[%s2281_s6 + $0x8] sm:$0xff]  ;;  %vm1679_vm7 = vcmask 1044480   ;;  %vm1681_vm8 = vcmask 331776   ;;  %vm1688_vm9 = vcmask 4096  }
  0x86   : > { %671 = vperm.xlu0 %1957, %v653_v28   ;;  %681 = vperm.xlu1 %1958, %v655_v30   ;;  %v657_v36 = vld [vmem:[%s2286_s18 + $0x20] sm:$0xff]  ;;  %v1886_v41 = vld [vmem:[%s2281_s6 + $0x28] sm:$0xff]  ;;  %v663_v43 = vld [vmem:[%s2286_s18 + $0x50] sm:$0xff] }
  0x87   : > { %841 = vmatpush.bf16.msra.mxu0 %v1847_v27  ;;  %1894 = vmatpush.bf16.msra.mxu2 %v1847_v27  ;;  %v662_v42 = vld [vmem:[%s2286_s18 + $0x48] sm:$0xff]  ;;  %v661_v44 = vld [vmem:[%s2286_s18 + $0x40] sm:$0xff]  ;;  %v664_v45 = vld [vmem:[%s2286_s18 + $0x58] sm:$0xff] }
  0x88   : > { %890 = vmatpush.bf16.msra.mxu1 %v1851_v29  ;;  %1896 = vmatpush.bf16.msra.mxu3 %v1851_v29  ;;  %v665_v46 = vld [vmem:[%s2286_s18 + $0x60] sm:$0xff]  ;;  %v666_v47 = vld [vmem:[%s2286_s18 + $0x68] sm:$0xff]  ;;  %v1883_v48 = vld [vmem:[%s2281_s6 + $0x10] sm:$0xff] }
  0x89   : > { %1959 = vset.pattern.permute.xlu2 %v2017_v31  ;;  %v1887_v49 = vld [vmem:[%s2281_s6 + $0x30] sm:$0xff]  ;;  %v668_v51 = vld [vmem:[%s2286_s18 + $0x78] sm:$0xff]  ;;  %v2337_v56 = vld [vmem:[%s2288_s13] sm:$0xff] }
  0x8a   : > { %1860 = vmatmul.msk.bf16.vlgmr.msra.gmra.mxu0 %vm809_vm1, %v1881_v32  ;;  %1864 = vmatmul.msk.bf16.vlgmr.msra.gmra.mxu2 %vm809_vm1, %v1885_v33  ;;  %v667_v50 = vld [vmem:[%s2286_s18 + $0x70] sm:$0xff]  ;;  %v1884_v52 = vld [vmem:[%s2281_s6 + $0x18] sm:$0xff]  ;;  %v2340_v57 = vld [vmem:[%s2288_s13 + $0x80] sm:$0xff]  ;;  %v1044_v62 = vunpack.c.l.bf16 %v2337_v56  ;;  %v1045_v6 = vunpack.c.h.bf16 %v2337_v56 }
  0x8b   : > { %1868 = vmatmul.msk.bf16.vlgmr.msra.gmra.mxu1 %vm809_vm1, %v1881_v32  ;;  %1872 = vmatmul.msk.bf16.vlgmr.msra.gmra.mxu3 %vm809_vm1, %v1885_v33  ;;  %v1888_v53 = vld [vmem:[%s2281_s6 + $0x38] sm:$0xff]  ;;  %v2343_v58 = vld [vmem:[%s2288_s13 + $0x100] sm:$0xff]  ;;  %v2352_v61 = vld [vmem:[%s2288_s13 + $0x8] sm:$0xff]  ;;  %v1076_v63 = vunpack.c.l.bf16 %v2340_v57  ;;  %v1077_v8 = vunpack.c.h.bf16 %v2340_v57 }
  0x8c   : > { %691 = vperm.xlu2 %1959, %v657_v36   ;;  %v2346_v59 = vld [vmem:[%s2288_s13 + $0x180] sm:$0xff]  ;;  %v2357_v0 = vld [vmem:[%s2288_s13 + $0x88] sm:$0xff]  ;;  %v1108_v3 = vunpack.c.l.bf16 %v2343_v58  ;;  %v1109_v9 = vunpack.c.h.bf16 %v2343_v58  ;;  %v1046_v15 = vunpack.c.l.bf16 %v2352_v61  ;;  %v1047_v22 = vunpack.c.h.bf16 %v2352_v61  ;;  %v2464_v36 = vld [vmem:[%s2288_s13 + $0x98] sm:$0xff] }
  0x8d   : > { %v2349_v60 = vld [vmem:[%s2288_s13 + $0x200] sm:$0xff]  ;;  %v2360_v1 = vld [vmem:[%s2288_s13 + $0x108] sm:$0xff]  ;;  %v1140_v4 = vunpack.c.l.bf16 %v2346_v59  ;;  %v1141_v10 = vunpack.c.h.bf16 %v2346_v59  ;;  %v1078_v16 = vunpack.c.l.bf16 %v2357_v0  ;;  %v2489_v27 = vld [vmem:[%s2288_s13 + $0x198] sm:$0xff] }
  0x8e   : > { %676 = vperm.xlu0 %1957, %v654_v34   ;;  %686 = vperm.xlu1 %1958, %v656_v35   ;;  %v2363_v2 = vld [vmem:[%s2288_s13 + $0x188] sm:$0xff]  ;;  %v1172_v5 = vunpack.c.l.bf16 %v2349_v60  ;;  %v1173_v11 = vunpack.c.h.bf16 %v2349_v60  ;;  %v2379_v13 = vld [vmem:[%s2288_s13 + $0x40] sm:$0xff]  ;;  %v1110_v17 = vunpack.c.l.bf16 %v2360_v1  ;;  %v2467_v35 = vld [vmem:[%s2288_s13 + $0x118] sm:$0xff] }
  0x8f   : > { %v2370_v7 = vld [vmem:[%s2288_s13 + $0x208] sm:$0xff]  ;;  %v1142_v18 = vunpack.c.l.bf16 %v2363_v2  ;;  %v2388_v19 = vld [vmem:[%s2288_s13 + $0xc0] sm:$0xff]  ;;  %v2503_v23 = vld [vmem:[%s2288_s13 + $0x218] sm:$0xff] }
  0x90   : > { %v2391_v20 = vld [vmem:[%s2288_s13 + $0x140] sm:$0xff]  ;;  %v2408_v31 = vld [vmem:[%s2288_s13 + $0x48] sm:$0xff]  ;;  %v3204_v61 = vunpack.c.h.bf16 %v2370_v7 }
  0x91   : > { %v2398_v25 = vld [vmem:[%s2288_s13 + $0x1c0] sm:$0xff]  ;;  %v2411_v32 = vld [vmem:[%s2288_s13 + $0xc8] sm:$0xff] }
  0x92   : > { %v2401_v26 = vld [vmem:[%s2288_s13 + $0x240] sm:$0xff] }
  0x94   : > { %696 = vperm.xlu2 %1959, %v658_v37  }
  0x96   : > { %701 = vperm.xlu0 %1957, %v659_v38   ;;  %706 = vperm.xlu1 %1958, %v660_v39   ;;  %v2418_v38 = vld [vmem:[%s2288_s13 + $0x148] sm:$0xff] }
  0x9a   : > { %1861 = vmatmul.msk.bf16.gmra.mxu0 %vm809_vm1, %v1882_v40  ;;  %1865 = vmatmul.msk.bf16.gmra.mxu2 %vm809_vm1, %v1886_v41 }
  0x9b   : > { %1869 = vmatmul.msk.bf16.gmra.mxu1 %vm809_vm1, %v1882_v40  ;;  %1873 = vmatmul.msk.bf16.gmra.mxu3 %vm809_vm1, %v1886_v41 }
  0x9c   : > { %711 = vperm.xlu2 %1959, %v661_v44   ;;  %v2425_v44 = vld [vmem:[%s2288_s13 + $0x1c8] sm:$0xff] }
  0x9e   : > { %716 = vperm.xlu0 %1957, %v662_v42   ;;  %721 = vperm.xlu1 %1958, %v663_v43  }
  0xa4   : > { %726 = vperm.xlu2 %1959, %v664_v45   ;;  %v2428_v45 = vld [vmem:[%s2288_s13 + $0x248] sm:$0xff] }
  0xa6   : > { %731 = vperm.xlu0 %1957, %v665_v46   ;;  %736 = vperm.xlu1 %1958, %v666_v47   ;;  %v2461_v47 = vld [vmem:[%s2288_s13 + $0x18] sm:$0xff] }
  0xaa   : > { %1862 = vmatmul.msk.bf16.gmra.mxu0 %vm809_vm1, %v1883_v48  ;;  %1866 = vmatmul.msk.bf16.gmra.mxu2 %vm809_vm1, %v1887_v49 }
  0xab   : > { %1870 = vmatmul.msk.bf16.gmra.mxu1 %vm809_vm1, %v1883_v48  ;;  %1874 = vmatmul.msk.bf16.gmra.mxu3 %vm809_vm1, %v1887_v49  ;;  %v2448_v48 = vld [vmem:[%s2288_s13 + $0x190] sm:$0xff] }
  0xac   : > { %741 = vperm.xlu2 %1959, %v667_v50   ;;  %v2435_v50 = vld [vmem:[%s2288_s13 + $0x10] sm:$0xff] }
  0xad   : > { %v2451_v49 = vld [vmem:[%s2288_s13 + $0x210] sm:$0xff] }
  0xae   : > { %746 = vperm.xlu0 %1957, %v668_v51   ;;  %v2438_v51 = vld [vmem:[%s2288_s13 + $0x90] sm:$0xff] }
  0xba   : > { %1863 = vmatmul.msk.bf16.gmra.mxu0 %vm809_vm1, %v1884_v52  ;;  %1867 = vmatmul.msk.bf16.gmra.mxu2 %vm809_vm1, %v1888_v53 }
  0xbb   : > { %1871 = vmatmul.msk.bf16.gmra.mxu1 %vm809_vm1, %v1884_v52  ;;  %1875 = vmatmul.msk.bf16.gmra.mxu3 %vm809_vm1, %v1888_v53  ;;  %v2441_v52 = vld [vmem:[%s2288_s13 + $0x110] sm:$0xff] }
  0xe6   : > { %v2332_v54 = vpop.permute.xlu2 %691 }
  0xee   : > { %v2376_v12 = vpop.permute.xlu2 %696 }
  0xf8   : > { %v2334_v55 = vpop.permute.xlu0 %671  ;;  %v682_v58 = vpop.permute.xlu1 %681 }
 0x100   : > { %v2381_v14 = vpop.permute.xlu0 %676 }
 0x107   : > { %v843_v33 = vpop.f32.mrf.mxu0 }
 0x108   : > { %v892_v39 = vpop.f32.mrf.mxu1  ;;  %v844_v53 = vadd.f32 %v843_v33, %v2334_v55  ;;  %v2473_v30 = vpop.permute.xlu0 %701 }
 0x109   : > { %v893_v46 = vadd.f32 %v892_v39, %v2334_v55 }
 0x10a   : > { %v932_v33 = vmax.f32 %v844_v53, 0.0 }
 0x10b   : > { %v933_v40 = vmax.f32 %v893_v46, 0.0  ;;  %v712_v46 = vpop.permute.xlu2 %711 }
 0x10d   : > { %v1205_v34 = vmul.f32 %v1045_v6, %v933_v40  ;;  %v863_v43 = vpop.f32.mrf.mxu2  ;;  %v1237_v55 = vmul.f32 %v1077_v8, %v933_v40  ;;  %v1269_v39 = vmul.f32 %v1109_v9, %v933_v40  ;;  %v1301_v41 = vmul.f32 %v1141_v10, %v933_v40 }
 0x10e   : > { %v912_v42 = vpop.f32.mrf.mxu3  ;;  %v864_v6 = vadd.f32 %v863_v43, %v712_v46  ;;  %v1333_v53 = vmul.f32 %v1173_v11, %v933_v40  ;;  %v1204_v8 = vmul.f32 %v1044_v62, %v932_v33  ;;  %v1236_v9 = vmul.f32 %v1076_v63, %v932_v33 }
 0x10f   : > { %v845_v29 = vpop.f32.mrf.mxu0  ;;  %v913_v24 = vadd.f32 %v912_v42, %v712_v46  ;;  %v1300_v10 = vmul.f32 %v1140_v4, %v932_v33  ;;  %v1332_v11 = vmul.f32 %v1172_v5, %v932_v33  ;;  %v1386_v56 = vsel %vm1385_vm2, %v1205_v34, 0.0 }
 0x110   : > { %v846_v21 = vadd.f32 %v845_v29, %v2381_v14  ;;  %v894_v28 = vpop.f32.mrf.mxu1  ;;  %v1268_v29 = vmul.f32 %v1108_v3, %v932_v33  ;;  %v1444_v57 = vsel %vm1385_vm2, %v1237_v55, 0.0  ;;  %v1502_v62 = vsel %vm1385_vm2, %v1269_v39, 0.0 }
 0x111   : > { %v895_v37 = vadd.f32 %v894_v28, %v2381_v14  ;;  %v948_v63 = vmax.f32 %v864_v6, 0.0  ;;  %v1560_v3 = vsel %vm1385_vm2, %v1301_v41, 0.0  ;;  %v949_v59 = vmax.f32 %v913_v24, 0.0 }
 0x112   : > { %v934_v43 = vmax.f32 %v846_v21, 0.0  ;;  %v1618_v21 = vsel %vm1385_vm2, %v1333_v53, 0.0  ;;  %v3201_v24 = vunpack.c.h.bf16 %v2357_v0  ;;  %v3202_v39 = vunpack.c.h.bf16 %v2360_v1 }
 0x113   : > { %v935_v14 = vmax.f32 %v895_v37, 0.0  ;;  %v3203_v55 = vunpack.c.h.bf16 %v2363_v2  ;;  %v3205_v33 = vunpack.c.l.bf16 %v2379_v13  ;;  %v3207_v0 = vunpack.c.l.bf16 %v2370_v7 }
 0x114   : > { %v1206_v60 = vmul.f32 %v1046_v15, %v934_v43  ;;  %v1238_v5 = vmul.f32 %v1078_v16, %v934_v43  ;;  %v1270_v40 = vmul.f32 %v1110_v17, %v934_v43  ;;  %v1302_v41 = vmul.f32 %v1142_v18, %v934_v43 }
 0x115   : > { %v1207_v34 = vmul.f32 %v1047_v22, %v935_v14  ;;  %v1239_v42 = vmul.f32 %v3201_v24, %v935_v14  ;;  %v1271_v15 = vmul.f32 %v3202_v39, %v935_v14  ;;  %v1303_v16 = vmul.f32 %v3203_v55, %v935_v14  ;;  %v717_v55 = vpop.permute.xlu0 %716  ;;  %v865_v4 = vpop.f32.mrf.mxu2 }
 0x116   : > { %v1335_v22 = vmul.f32 %v3204_v61, %v935_v14  ;;  %v2537_v46 = vmul.f32 %v3205_v33, %v948_v63  ;;  %v3206_v17 = vunpack.c.l.bf16 %v2388_v19  ;;  %v1334_v18 = vmul.f32 %v3207_v0, %v934_v43  ;;  %v914_v7 = vpop.f32.mrf.mxu3 }
 0x117   : > { %v3208_v1 = vunpack.c.h.bf16 %v2379_v13  ;;  %v3209_v2 = vunpack.c.h.bf16 %v2388_v19  ;;  %v3210_v39 = vunpack.c.l.bf16 %v2391_v20  ;;  %v2553_v61 = vadd.f32 %v1206_v60, %v1204_v8 }
 0x118   : > { %v2541_v53 = vmul.f32 %v3206_v17, %v948_v63  ;;  %v2555_v33 = vadd.f32 %v1238_v5, %v1236_v9  ;;  %v1387_v17 = vsel %vm1385_vm2, %v1207_v34, 0.0  ;;  %v3211_v43 = vunpack.c.h.bf16 %v2391_v20  ;;  %v897_v8 = vpop.f32.mrf.mxu1 }
 0x119   : > { %v1221_v6 = vmul.f32 %v3208_v1, %v949_v59  ;;  %v1253_v24 = vmul.f32 %v3209_v2, %v949_v59  ;;  %v2551_v14 = vmul.f32 %v3210_v39, %v948_v63  ;;  %v2560_v0 = vadd.f32 %v1270_v40, %v1268_v29  ;;  %v848_v39 = vpop.f32.mrf.mxu0 }
 0x11a   : > { %v1285_v13 = vmul.f32 %v3211_v43, %v949_v59  ;;  %v2562_v19 = vadd.f32 %v1302_v41, %v1300_v10  ;;  %v1445_v1 = vsel %vm1385_vm2, %v1239_v42, 0.0  ;;  %v1503_v2 = vsel %vm1385_vm2, %v1271_v15, 0.0  ;;  %v687_v42 = vpop.permute.xlu1 %686 }
 0x11b   : > { %v1561_v9 = vsel %vm1385_vm2, %v1303_v16, 0.0  ;;  %v1619_v60 = vsel %vm1385_vm2, %v1335_v22, 0.0  ;;  %v866_v5 = vadd.f32 %v865_v4, %v717_v55  ;;  %v915_v34 = vadd.f32 %v914_v7, %v717_v55 }
 0x11c   : > { %v2568_v28 = vadd.f32 %v1334_v18, %v1332_v11  ;;  %v2570_v20 = vadd.f32 %v1387_v17, %v1386_v56  ;;  %v3212_v29 = vunpack.c.h.bf16 %v2398_v25  ;;  %v3213_v40 = vunpack.c.h.bf16 %v2401_v26 }
 0x11d   : > { %v3214_v15 = vunpack.c.l.bf16 %v2398_v25  ;;  %v951_v16 = vmax.f32 %v915_v34, 0.0  ;;  %v849_v22 = vadd.f32 %v848_v39, %v682_v58  ;;  %v898_v4 = vadd.f32 %v897_v8, %v682_v58  ;;  %v2599_v58 = vld [vmem:[%s2288_s13 + $0x50] sm:$0xff] }
 0x11e   : > { %v1317_v10 = vmul.f32 %v3212_v29, %v949_v59  ;;  %v1349_v41 = vmul.f32 %v3213_v40, %v949_v59  ;;  %v2580_v55 = vadd.f32 %v1445_v1, %v1444_v57  ;;  %v2582_v11 = vadd.f32 %v1503_v2, %v1502_v62 }
 0x11f   : > { %v2578_v43 = vmul.f32 %v3214_v15, %v948_v63  ;;  %v2584_v56 = vadd.f32 %v1561_v9, %v1560_v3  ;;  %v2586_v18 = vadd.f32 %v1619_v60, %v1618_v21  ;;  %v3215_v17 = vunpack.c.l.bf16 %v2401_v26 }
 0x120   : > { %v2593_v59 = vsel %vm1385_vm2, %v1221_v6, 0.0  ;;  %v2596_v25 = vsel %vm1385_vm2, %v1253_v24, 0.0  ;;  %v950_v39 = vmax.f32 %v866_v5, 0.0  ;;  %v2602_v57 = vsel %vm1385_vm2, %v1285_v13, 0.0 }
 0x121   : > { %v2590_v7 = vmul.f32 %v3215_v17, %v948_v63  ;;  %3216 = vst [vmem:[#allocation3_spill] sm:$0xff] %v2602_v57  ;;  %v2605_v62 = vsel %vm1385_vm2, %v1317_v10, 0.0  ;;  %v2608_v3 = vsel %vm1385_vm2, %v1349_v41, 0.0  ;;  %v1083_v26 = vunpack.c.h.bf16 %v2464_v36 }
 0x122   : > { %3217 = vst [vmem:[#allocation4_spill] sm:$0xff] %v2605_v62  ;;  %v3219_v63 = vunpack.c.h.bf16 %v2408_v31  ;;  %v936_v6 = vmax.f32 %v849_v22, 0.0  ;;  %v937_v24 = vmax.f32 %v898_v4, 0.0  ;;  %v1115_v1 = vunpack.c.h.bf16 %v2467_v35 }
 0x123   : > { %3218 = vst [vmem:[#allocation5_spill] sm:$0xff] %v2608_v3  ;;  %v3220_v2 = vunpack.c.h.bf16 %v2411_v32  ;;  %v1147_v13 = vunpack.c.h.bf16 %v2489_v27  ;;  %v1179_v9 = vunpack.c.h.bf16 %v2503_v23  ;;  %v3221_v5 = vunpack.c.l.bf16 %v2408_v31  ;;  %v899_v3 = vpop.f32.mrf.mxu1 }
 0x124   : > { %v1223_v21 = vmul.f32 %v3219_v63, %v951_v16  ;;  %v3222_v29 = vunpack.c.l.bf16 %v2411_v32  ;;  %v3223_v40 = vunpack.c.l.bf16 %v2418_v38  ;;  %v3224_v22 = vunpack.c.h.bf16 %v2418_v38 }
 0x125   : > { %v1255_v8 = vmul.f32 %v3220_v2, %v951_v16  ;;  %v2621_v34 = vmul.f32 %v3221_v5, %v950_v39  ;;  %v3225_v17 = vunpack.c.l.bf16 %v2425_v44  ;;  %v3226_v31 = vunpack.c.h.bf16 %v2425_v44 }
 0x126   : > { %v2625_v10 = vmul.f32 %v3222_v29, %v950_v39  ;;  %v2629_v41 = vmul.f32 %v3223_v40, %v950_v39  ;;  %v1287_v4 = vmul.f32 %v3224_v22, %v951_v16  ;;  %v3227_v32 = vunpack.c.l.bf16 %v2428_v45  ;;  %v850_v29 = vpop.f32.mrf.mxu0 }
 0x127   : > { %v2636_v63 = vmul.f32 %v3225_v17, %v950_v39  ;;  %v1319_v2 = vmul.f32 %v3226_v31, %v951_v16  ;;  %v3229_v40 = vunpack.c.h.bf16 %v2428_v45  ;;  %v2647_v15 = vsel %vm1385_vm2, %v1223_v21, 0.0 }
 0x128   : > { %v2642_v5 = vmul.f32 %v3227_v32, %v950_v39  ;;  %3230 = vst [vmem:[#allocation7_spill] sm:$0xff] %v2647_v15  ;;  %v3231_v38 = vunpack.c.h.bf16 %v2435_v50  ;;  %v3232_v17 = vunpack.c.h.bf16 %v2438_v51  ;;  %v2654_v44 = vsel %vm1385_vm2, %v1255_v8, 0.0  ;;  %v2668_v8 = vpop.permute.xlu1 %706 }
 0x129   : > { %v1351_v60 = vmul.f32 %v3229_v40, %v951_v16  ;;  %3233 = vst [vmem:[#allocation8_spill] sm:$0xff] %v2654_v44  ;;  %v3234_v39 = vunpack.c.l.bf16 %v2435_v50  ;;  %v3235_v32 = vunpack.c.l.bf16 %v2438_v51  ;;  %v3236_v16 = vunpack.c.h.bf16 %v2441_v52 }
 0x12a   : > { %3228 = vst [vmem:[#allocation6_spill] sm:$0xff] %v2642_v5  ;;  %v1209_v22 = vmul.f32 %v3231_v38, %v937_v24  ;;  %v1241_v37 = vmul.f32 %v3232_v17, %v937_v24  ;;  %v3237_v40 = vunpack.c.l.bf16 %v2441_v52  ;;  %v3238_v38 = vunpack.c.l.bf16 %v2448_v48 }
 0x12b   : > { %v1208_v31 = vmul.f32 %v3234_v39, %v936_v6  ;;  %v1240_v45 = vmul.f32 %v3235_v32, %v936_v6  ;;  %v1273_v21 = vmul.f32 %v3236_v16, %v937_v24  ;;  %v3239_v17 = vunpack.c.h.bf16 %v2448_v48 }
 0x12c   : > { %v1272_v62 = vmul.f32 %v3237_v40, %v936_v6  ;;  %v1304_v5 = vmul.f32 %v3238_v38, %v936_v6  ;;  %v851_v44 = vadd.f32 %v850_v29, %v687_v42  ;;  %v2671_v50 = vsel %vm1385_vm2, %v1287_v4, 0.0 }
 0x12d   : > { %v1305_v57 = vmul.f32 %v3239_v17, %v937_v24  ;;  %3240 = vst [vmem:[#allocation9_spill] sm:$0xff] %v2671_v50  ;;  %v3241_v51 = vunpack.c.l.bf16 %v2451_v49  ;;  %v3242_v32 = vunpack.c.h.bf16 %v2451_v49  ;;  %v900_v52 = vadd.f32 %v899_v3, %v687_v42  ;;  %v868_v17 = vpop.f32.mrf.mxu2 }
 0x12e   : > { %v2678_v40 = vsel %vm1385_vm2, %v1319_v2, 0.0  ;;  %v1389_v38 = vsel %vm1385_vm2, %v1209_v22, 0.0  ;;  %v1447_v48 = vsel %vm1385_vm2, %v1241_v37, 0.0  ;;  %v938_v15 = vmax.f32 %v851_v44, 0.0 }
 0x12f   : > { %v1336_v39 = vmul.f32 %v3241_v51, %v936_v6  ;;  %v1337_v16 = vmul.f32 %v3242_v32, %v937_v24  ;;  %3243 = vst [vmem:[#allocation10_spill] sm:$0xff] %v2678_v40  ;;  %v2683_v29 = vsel %vm1385_vm2, %v1351_v60, 0.0  ;;  %v1365_v4 = vadd.f32 %v2553_v61, %v1208_v31 }
 0x130   : > { %3244 = vst [vmem:[#allocation11_spill] sm:$0xff] %v2683_v29  ;;  %v1505_v49 = vsel %vm1385_vm2, %v1273_v21, 0.0  ;;  %v939_v6 = vmax.f32 %v900_v52, 0.0  ;;  %v1424_v42 = vadd.f32 %v2555_v33, %v1240_v45  ;;  %v1482_v3 = vadd.f32 %v2560_v0, %v1272_v62 }
 0x131   : > { %v1540_v24 = vadd.f32 %v2562_v19, %v1304_v5  ;;  %v1563_v37 = vsel %vm1385_vm2, %v1305_v57, 0.0  ;;  %v1598_v2 = vadd.f32 %v2568_v28, %v1336_v39  ;;  %v1390_v60 = vadd.f32 %v1389_v38, %v2570_v20  ;;  %v2703_v57 = vld [vmem:[%s2288_s13 + $0xd0] sm:$0xff] }
 0x132   : > { %v1448_v22 = vadd.f32 %v1447_v48, %v2580_v55  ;;  %v1621_v61 = vsel %vm1385_vm2, %v1337_v16, 0.0  ;;  %v1506_v44 = vadd.f32 %v1505_v49, %v2582_v11  ;;  %v3245_v31 = vunpack.c.l.bf16 %v2461_v47  ;;  %v2706_v28 = vld [vmem:[%s2288_s13 + $0x150] sm:$0xff]  ;;  %v917_v55 = vpop.f32.mrf.mxu3 }
 0x133   : > { %v3246_v33 = vunpack.c.l.bf16 %v2464_v36  ;;  %v3247_v19 = vunpack.c.h.bf16 %v2461_v47  ;;  %v1564_v20 = vadd.f32 %v1563_v37, %v2584_v56  ;;  %v3248_v5 = vunpack.c.l.bf16 %v2467_v35  ;;  %v1022_v49 = vld [vmem:[%s2288_s13 + $0x1d0] sm:$0xff] }
 0x134   : > { %v1210_v21 = vmul.f32 %v3245_v31, %v938_v15  ;;  %v1243_v11 = vmul.f32 %v1083_v26, %v939_v6  ;;  %v1275_v51 = vmul.f32 %v1115_v1, %v939_v6  ;;  %v1622_v39 = vadd.f32 %v1621_v61, %v2586_v18  ;;  %v1038_v61 = vld [vmem:[%s2288_s13 + $0x250] sm:$0xff] }
 0x135   : > { %v1242_v0 = vmul.f32 %v3246_v33, %v938_v15  ;;  %v1211_v62 = vmul.f32 %v3247_v19, %v939_v6  ;;  %v1274_v45 = vmul.f32 %v3248_v5, %v938_v15  ;;  %v3249_v36 = vunpack.c.l.bf16 %v2489_v27 }
 0x136   : > { %v1307_v47 = vmul.f32 %v1147_v13, %v939_v6  ;;  %v1339_v16 = vmul.f32 %v1179_v9, %v939_v6  ;;  %v3250_v52 = vunpack.c.l.bf16 %v2503_v23  ;;  %v1096_v48 = vunpack.c.l.bf16 %v2703_v57  ;;  %v722_v13 = vpop.permute.xlu1 %721 }
 0x137   : > { %v1306_v32 = vmul.f32 %v3249_v36, %v938_v15  ;;  %v1097_v56 = vunpack.c.h.bf16 %v2703_v57  ;;  %v1128_v35 = vunpack.c.l.bf16 %v2706_v28  ;;  %v2719_v26 = vadd.f32 %v1365_v4, %v1210_v21  ;;  %v870_v21 = vpop.f32.mrf.mxu2  ;;  %v2740_v57 = vld [vmem:[%s2288_s13 + $0x58] sm:$0xff] }
 0x138   : > { %v1338_v38 = vmul.f32 %v3250_v52, %v938_v15  ;;  %v2721_v1 = vadd.f32 %v1424_v42, %v1242_v0  ;;  %v1391_v27 = vsel %vm1385_vm2, %v1211_v62, 0.0  ;;  %v1129_v18 = vunpack.c.h.bf16 %v2706_v28  ;;  %v2746_v28 = vld [vmem:[%s2288_s13 + $0x158] sm:$0xff] }
 0x139   : > { %v2725_v9 = vadd.f32 %v1482_v3, %v1274_v45  ;;  %v1449_v23 = vsel %vm1385_vm2, %v1243_v11, 0.0  ;;  %v1507_v15 = vsel %vm1385_vm2, %v1275_v51, 0.0  ;;  %v918_v6 = vadd.f32 %v917_v55, %v722_v13  ;;  %v727_v3 = vpop.permute.xlu2 %726  ;;  %v2753_v11 = vld [vmem:[%s2288_s13 + $0x1d8] sm:$0xff] }
 0x13a   : > { %v2730_v4 = vadd.f32 %v1540_v24, %v1306_v32  ;;  %v1565_v42 = vsel %vm1385_vm2, %v1307_v47, 0.0  ;;  %v1623_v37 = vsel %vm1385_vm2, %v1339_v16, 0.0  ;;  %v869_v31 = vadd.f32 %v868_v17, %v722_v13  ;;  %v2743_v24 = vld [vmem:[%s2288_s13 + $0xd8] sm:$0xff] }
 0x13b   : > { %v2735_v33 = vadd.f32 %v1598_v2, %v1338_v38  ;;  %v2737_v0 = vadd.f32 %v1391_v27, %v1390_v60  ;;  %v953_v19 = vmax.f32 %v918_v6, 0.0  ;;  %v871_v62 = vadd.f32 %v870_v21, %v727_v3  ;;  %v1039_v32 = vld [vmem:[%s2288_s13 + $0x258] sm:$0xff] }
 0x13c   : > { %v2748_v55 = vadd.f32 %v1449_v23, %v1448_v22  ;;  %v2750_v5 = vadd.f32 %v1507_v15, %v1506_v44  ;;  %v1160_v17 = vunpack.c.l.bf16 %v1022_v49  ;;  %v1161_v45 = vunpack.c.h.bf16 %v1022_v49  ;;  %v919_v23 = vpop.f32.mrf.mxu3 }
 0x13d   : > { %v2755_v2 = vadd.f32 %v1565_v42, %v1564_v20  ;;  %v2757_v60 = vadd.f32 %v1623_v37, %v1622_v39  ;;  %v1192_v51 = vunpack.c.l.bf16 %v1038_v61  ;;  %v1193_v36 = vunpack.c.h.bf16 %v1038_v61  ;;  %v853_v42 = vpop.f32.mrf.mxu0 }
 0x13e   : > { %v952_v47 = vmax.f32 %v869_v31, 0.0  ;;  %v1066_v16 = vunpack.c.l.bf16 %v2740_v57  ;;  %v1098_v52 = vunpack.c.l.bf16 %v2743_v24  ;;  %v1130_v22 = vunpack.c.l.bf16 %v2746_v28 }
 0x13f   : > { %v3251_v44 = vunpack.c.h.bf16 %v2599_v58  ;;  %v1257_v27 = vmul.f32 %v1097_v56, %v953_v19  ;;  %v954_v13 = vmax.f32 %v871_v62, 0.0  ;;  %v1162_v20 = vunpack.c.l.bf16 %v2753_v11 }
 0x140   : > { %v1289_v39 = vmul.f32 %v1129_v18, %v953_v19  ;;  %v1321_v15 = vmul.f32 %v1161_v45, %v953_v19  ;;  %v1194_v49 = vunpack.c.l.bf16 %v1039_v32  ;;  %v920_v6 = vadd.f32 %v919_v23, %v727_v3 }
 0x141   : > { %v1225_v38 = vmul.f32 %v3251_v44, %v953_v19  ;;  %v1353_v37 = vmul.f32 %v1193_v36, %v953_v19  ;;  %v1067_v61 = vunpack.c.h.bf16 %v2740_v57  ;;  %v1099_v31 = vunpack.c.h.bf16 %v2743_v24  ;;  %v902_v19 = vpop.f32.mrf.mxu1  ;;  %v984_v36 = vld [vmem:[%s2288_s13 + $0xa0] sm:$0xff] }
 0x142   : > { %v1131_v21 = vunpack.c.h.bf16 %v2746_v28  ;;  %v3252_v56 = vunpack.c.l.bf16 %v2599_v58  ;;  %v2773_v44 = vmul.f32 %v1096_v48, %v952_v47  ;;  %v2775_v18 = vmul.f32 %v1128_v35, %v952_v47 }
 0x143   : > { %v2777_v3 = vmul.f32 %v1160_v17, %v952_v47  ;;  %v2779_v57 = vmul.f32 %v1192_v51, %v952_v47  ;;  %v2782_v24 = vsel %vm1385_vm2, %v1225_v38, 0.0  ;;  %v2785_v28 = vsel %vm1385_vm2, %v1257_v27, 0.0  ;;  %v968_v51 = vld [vmem:[%s2288_s13 + $0x20] sm:$0xff] }
 0x144   : > { %v2771_v62 = vmul.f32 %v3252_v56, %v952_v47  ;;  %3255 = vst [vmem:[#allocation14_spill] sm:$0xff] %v2782_v24  ;;  %v854_v58 = vadd.f32 %v853_v42, %v2332_v54  ;;  %v2789_v48 = vsel %vm1385_vm2, %v1289_v39, 0.0  ;;  %v2792_v35 = vsel %vm1385_vm2, %v1321_v15, 0.0  ;;  %v1000_v47 = vld [vmem:[%s2288_s13 + $0x120] sm:$0xff] }
 0x145   : > { %3253 = vst [vmem:[#allocation12_spill] sm:$0xff] %v2777_v3  ;;  %v2794_v17 = vmul.f32 %v1066_v16, %v954_v13  ;;  %v2796_v45 = vmul.f32 %v1098_v52, %v954_v13  ;;  %v2802_v38 = vsel %vm1385_vm2, %v1353_v37, 0.0  ;;  %v2804_v27 = vmul.f32 %v1130_v22, %v954_v13  ;;  %v1016_v42 = vld [vmem:[%s2288_s13 + $0x1a0] sm:$0xff] }
 0x146   : > { %3254 = vst [vmem:[#allocation13_spill] sm:$0xff] %v2779_v57  ;;  %v955_v23 = vmax.f32 %v920_v6, 0.0  ;;  %v1032_v56 = vld [vmem:[%s2288_s13 + $0x220] sm:$0xff]  ;;  %v903_v39 = vadd.f32 %v902_v19, %v2332_v54  ;;  %v2809_v57 = vmul.f32 %v1162_v20, %v954_v13  ;;  %v2811_v15 = vmul.f32 %v1194_v49, %v954_v13  ;;  %v873_v49 = vpop.f32.mrf.mxu2 }
 0x147   : > { %3256 = vst [vmem:[#allocation15_spill] sm:$0xff] %v2785_v28  ;;  %v1163_v16 = vunpack.c.h.bf16 %v2753_v11  ;;  %v1195_v52 = vunpack.c.h.bf16 %v1039_v32  ;;  %v940_v29 = vmax.f32 %v854_v58, 0.0  ;;  %v1116_v40 = vunpack.c.l.bf16 %v1000_v47 }
 0x148   : > { %3257 = vst [vmem:[#allocation16_spill] sm:$0xff] %v2789_v48  ;;  %v1084_v48 = vunpack.c.l.bf16 %v984_v36  ;;  %v1148_v37 = vunpack.c.l.bf16 %v1016_v42  ;;  %v941_v22 = vmax.f32 %v903_v39, 0.0  ;;  %v1053_v28 = vunpack.c.h.bf16 %v968_v51 }
 0x149   : > { %3258 = vst [vmem:[#allocation17_spill] sm:$0xff] %v2792_v35  ;;  %v1052_v35 = vunpack.c.l.bf16 %v968_v51  ;;  %v1227_v6 = vmul.f32 %v1067_v61, %v955_v23  ;;  %v1291_v50 = vmul.f32 %v1131_v21, %v955_v23  ;;  %v1323_v54 = vmul.f32 %v1163_v16, %v955_v23 }
 0x14a   : > { %3259 = vst [vmem:[#allocation18_spill] sm:$0xff] %v2794_v17  ;;  %v1355_v20 = vmul.f32 %v1195_v52, %v955_v23  ;;  %v1117_v19 = vunpack.c.h.bf16 %v1000_v47  ;;  %v1149_v13 = vunpack.c.h.bf16 %v1016_v42  ;;  %v1244_v11 = vmul.f32 %v1084_v48, %v940_v29  ;;  %v1008_v52 = vld [vmem:[%s2288_s13 + $0x160] sm:$0xff] }
 0x14b   : > { %3260 = vst [vmem:[#allocation19_spill] sm:$0xff] %v2796_v45  ;;  %v1085_v45 = vunpack.c.h.bf16 %v984_v36  ;;  %v1181_v32 = vunpack.c.h.bf16 %v1032_v56  ;;  %v1213_v58 = vmul.f32 %v1053_v28, %v941_v22  ;;  %v1276_v17 = vmul.f32 %v1116_v40, %v940_v29 }
 0x14c   : > { %3261 = vst [vmem:[#allocation20_spill] sm:$0xff] %v2802_v38  ;;  %v1180_v38 = vunpack.c.l.bf16 %v1032_v56  ;;  %v1308_v24 = vmul.f32 %v1148_v37, %v940_v29  ;;  %v2815_v61 = vsel %vm1385_vm2, %v1227_v6, 0.0  ;;  %v1277_v21 = vmul.f32 %v1117_v19, %v941_v22 }
 0x14d   : > { %3262 = vst [vmem:[#allocation21_spill] sm:$0xff] %v2804_v27  ;;  %v1259_v27 = vmul.f32 %v1099_v31, %v955_v23  ;;  %v1245_v51 = vmul.f32 %v1085_v45, %v941_v22  ;;  %v2821_v48 = vsel %vm1385_vm2, %v1291_v50, 0.0  ;;  %v2824_v28 = vsel %vm1385_vm2, %v1323_v54, 0.0  ;;  %v922_v45 = vpop.f32.mrf.mxu3  ;;  %v992_v23 = vld [vmem:[%s2288_s13 + $0xe0] sm:$0xff]  ;;  %v855_v54 = vpop.f32.mrf.mxu0 }
 0x14e   : > { %3263 = vst [vmem:[#allocation22_spill] sm:$0xff] %v2809_v57  ;;  %v732_v57 = vpop.permute.xlu0 %731  ;;  %v1340_v3 = vmul.f32 %v1180_v38, %v940_v29  ;;  %v1309_v40 = vmul.f32 %v1149_v13, %v941_v22  ;;  %v2828_v47 = vsel %vm1385_vm2, %v1355_v20, 0.0  ;;  %v1393_v50 = vsel %vm1385_vm2, %v1213_v58, 0.0  ;;  %v904_v13 = vpop.f32.mrf.mxu1 }
 0x14f   : > { %3264 = vst [vmem:[#allocation23_spill] sm:$0xff] %v2811_v15  ;;  %v1212_v15 = vmul.f32 %v1052_v35, %v940_v29  ;;  %v2818_v31 = vsel %vm1385_vm2, %v1259_v27, 0.0  ;;  %v874_v36 = vadd.f32 %v873_v49, %v732_v57  ;;  %v1341_v29 = vmul.f32 %v1181_v32, %v941_v22  ;;  %v976_v35 = vld [vmem:[%s2288_s13 + $0x60] sm:$0xff] }
 0x150   : > { %3265 = vst [vmem:[#allocation24_spill] sm:$0xff] %v2815_v61  ;;  %v2834_v27 = vadd.f32 %v2721_v1, %v1244_v11  ;;  %v2839_v42 = vadd.f32 %v2725_v9, %v1276_v17  ;;  %v2842_v56 = vadd.f32 %v2730_v4, %v1308_v24  ;;  %v2845_v39 = vadd.f32 %v2735_v33, %v1340_v3 }
 0x151   : > { %3266 = vst [vmem:[#allocation25_spill] sm:$0xff] %v2818_v31  ;;  %v2831_v38 = vadd.f32 %v2719_v26, %v1212_v15  ;;  %v1451_v16 = vsel %vm1385_vm2, %v1245_v51, 0.0  ;;  %v1024_v26 = vld [vmem:[%s2288_s13 + $0x1e0] sm:$0xff]  ;;  %v1509_v1 = vsel %vm1385_vm2, %v1277_v21, 0.0  ;;  %v956_v37 = vmax.f32 %v874_v36, 0.0  ;;  %v969_v21 = vld [vmem:[%s2288_s13 + $0x28] sm:$0xff] }
 0x152   : > { %3267 = vst [vmem:[#allocation26_spill] sm:$0xff] %v2821_v48  ;;  %v1040_v15 = vld [vmem:[%s2288_s13 + $0x260] sm:$0xff]  ;;  %v1068_v22 = vunpack.c.l.bf16 %v976_v35  ;;  %v923_v6 = vadd.f32 %v922_v45, %v732_v57  ;;  %v2853_v9 = vadd.f32 %v1393_v50, %v2737_v0  ;;  %v1567_v4 = vsel %vm1385_vm2, %v1309_v40, 0.0  ;;  %v985_v36 = vld [vmem:[%s2288_s13 + $0xa8] sm:$0xff] }
 0x153   : > { %3268 = vst [vmem:[#allocation27_spill] sm:$0xff] %v2824_v28  ;;  %v1625_v33 = vsel %vm1385_vm2, %v1341_v29, 0.0  ;;  %v1100_v3 = vunpack.c.l.bf16 %v992_v23  ;;  %v2858_v24 = vadd.f32 %v1451_v16, %v2748_v55  ;;  %v1132_v17 = vunpack.c.l.bf16 %v1008_v52  ;;  %v2893_v48 = vld [vmem:[%s2288_s13 + $0x68] sm:$0xff] }
 0x154   : > { %3269 = vst [vmem:[#allocation28_spill] sm:$0xff] %v2828_v47  ;;  %v1164_v20 = vunpack.c.l.bf16 %v1024_v26  ;;  %v1196_v19 = vunpack.c.l.bf16 %v1040_v15  ;;  %v2861_v57 = vadd.f32 %v1509_v1, %v2750_v5  ;;  %v957_v0 = vmax.f32 %v923_v6, 0.0  ;;  %v1017_v1 = vld [vmem:[%s2288_s13 + $0x1a8] sm:$0xff] }
 0x155   : > { %v1069_v49 = vunpack.c.h.bf16 %v976_v35  ;;  %v856_v11 = vadd.f32 %v855_v54, %v2376_v12  ;;  %v2865_v32 = vadd.f32 %v1567_v4, %v2755_v2  ;;  %v2868_v58 = vadd.f32 %v1625_v33, %v2757_v60  ;;  %v1001_v35 = vld [vmem:[%s2288_s13 + $0x128] sm:$0xff] }
 0x156   : > { %v2870_v55 = vmul.f32 %v1068_v22, %v956_v37  ;;  %v1101_v51 = vunpack.c.h.bf16 %v992_v23  ;;  %v2874_v40 = vmul.f32 %v1100_v3, %v956_v37  ;;  %v1133_v5 = vunpack.c.h.bf16 %v1008_v52  ;;  %v1033_v23 = vld [vmem:[%s2288_s13 + $0x228] sm:$0xff] }
 0x157   : > { %v1165_v29 = vunpack.c.h.bf16 %v1024_v26  ;;  %v905_v45 = vadd.f32 %v904_v13, %v2376_v12  ;;  %v2878_v50 = vmul.f32 %v1132_v17, %v956_v37  ;;  %v2880_v2 = vmul.f32 %v1164_v20, %v956_v37  ;;  %v875_v20 = vpop.f32.mrf.mxu2 }
 0x158   : > { %v2882_v16 = vmul.f32 %v1196_v19, %v956_v37  ;;  %v1197_v60 = vunpack.c.h.bf16 %v1040_v15  ;;  %v1229_v22 = vmul.f32 %v1069_v49, %v957_v0  ;;  %v942_v6 = vmax.f32 %v856_v11, 0.0  ;;  %v737_v49 = vpop.permute.xlu1 %736 }
 0x159   : > { %3270 = vst [vmem:[#allocation29_spill] sm:$0xff] %v2880_v2  ;;  %v1054_v54 = vunpack.c.l.bf16 %v969_v21  ;;  %v1086_v4 = vunpack.c.l.bf16 %v985_v36  ;;  %v1261_v33 = vmul.f32 %v1101_v51, %v957_v0  ;;  %v1118_v3 = vunpack.c.l.bf16 %v1001_v35 }
 0x15a   : > { %3271 = vst [vmem:[#allocation30_spill] sm:$0xff] %v2882_v16  ;;  %v943_v52 = vmax.f32 %v905_v45, 0.0  ;;  %v1055_v26 = vunpack.c.h.bf16 %v969_v21  ;;  %v1293_v47 = vmul.f32 %v1133_v5, %v957_v0  ;;  %v1325_v28 = vmul.f32 %v1165_v29, %v957_v0 }
 0x15b   : > { %v1150_v12 = vunpack.c.l.bf16 %v1017_v1  ;;  %v1087_v17 = vunpack.c.h.bf16 %v985_v36  ;;  %v1357_v13 = vmul.f32 %v1197_v60, %v957_v0  ;;  %v1182_v37 = vunpack.c.l.bf16 %v1033_v23 }
 0x15c   : > { %v1119_v19 = vunpack.c.h.bf16 %v1001_v35  ;;  %v1151_v15 = vunpack.c.h.bf16 %v1017_v1  ;;  %v2887_v11 = vsel %vm1385_vm2, %v1229_v22, 0.0  ;;  %v1214_v16 = vmul.f32 %v1054_v54, %v942_v6  ;;  %v993_v22 = vld [vmem:[%s2288_s13 + $0xe8] sm:$0xff] }
 0x15d   : > { %3272 = vst [vmem:[#allocation31_spill] sm:$0xff] %v2887_v11  ;;  %v1246_v51 = vmul.f32 %v1086_v4, %v942_v6  ;;  %v1183_v45 = vunpack.c.h.bf16 %v1033_v23  ;;  %v2890_v21 = vsel %vm1385_vm2, %v1261_v33, 0.0  ;;  %v1215_v5 = vmul.f32 %v1055_v26, %v943_v52  ;;  %v1009_v26 = vld [vmem:[%s2288_s13 + $0x168] sm:$0xff] }
 0x15e   : > { %3273 = vst [vmem:[#allocation32_spill] sm:$0xff] %v2890_v21  ;;  %v1247_v29 = vmul.f32 %v1087_v17, %v943_v52  ;;  %v876_v36 = vadd.f32 %v875_v20, %v737_v49  ;;  %v2896_v0 = vsel %vm1385_vm2, %v1293_v47, 0.0  ;;  %v1279_v35 = vmul.f32 %v1119_v19, %v943_v52  ;;  %v924_v19 = vpop.f32.mrf.mxu3 }
 0x15f   : > { %3274 = vst [vmem:[#allocation33_spill] sm:$0xff] %v2896_v0  ;;  %v1311_v60 = vmul.f32 %v1151_v15, %v943_v52  ;;  %v1343_v1 = vmul.f32 %v1183_v45, %v943_v52  ;;  %v2900_v54 = vsel %vm1385_vm2, %v1325_v28, 0.0  ;;  %v1278_v23 = vmul.f32 %v1118_v3, %v942_v6 }
 0x160   : > { %3275 = vst [vmem:[#allocation34_spill] sm:$0xff] %v2900_v54  ;;  %v1310_v4 = vmul.f32 %v1150_v12, %v942_v6  ;;  %v1342_v33 = vmul.f32 %v1182_v37, %v942_v6  ;;  %v2904_v17 = vsel %vm1385_vm2, %v1357_v13, 0.0  ;;  %v2907_v20 = vadd.f32 %v2831_v38, %v1214_v16  ;;  %v1025_v12 = vld [vmem:[%s2288_s13 + $0x1e8] sm:$0xff]  ;;  %v1034_v54 = vld [vmem:[%s2288_s13 + $0x230] sm:$0xff] }
 0x161   : > { %3276 = vst [vmem:[#allocation35_spill] sm:$0xff] %v2904_v17  ;;  %v2910_v47 = vadd.f32 %v2834_v27, %v1246_v51  ;;  %v1070_v52 = vunpack.c.l.bf16 %v2893_v48  ;;  %v1395_v15 = vsel %vm1385_vm2, %v1215_v5, 0.0  ;;  %v1453_v28 = vsel %vm1385_vm2, %v1247_v29, 0.0  ;;  %v1041_v6 = vld [vmem:[%s2288_s13 + $0x268] sm:$0xff]  ;;  %v858_v27 = vpop.f32.mrf.mxu0 }
 0x162   : > { %v958_v3 = vmax.f32 %v876_v36, 0.0  ;;  %v1102_v37 = vunpack.c.l.bf16 %v993_v22  ;;  %v1511_v13 = vsel %vm1385_vm2, %v1279_v35, 0.0  ;;  %v1569_v45 = vsel %vm1385_vm2, %v1311_v60, 0.0 }
 0x163   : > { %v1627_v38 = vsel %vm1385_vm2, %v1343_v1, 0.0  ;;  %v1134_v16 = vunpack.c.l.bf16 %v1009_v26  ;;  %v2921_v51 = vadd.f32 %v2839_v42, %v1278_v23  ;;  %v2924_v17 = vadd.f32 %v2842_v56, %v1310_v4  ;;  %v907_v42 = vpop.f32.mrf.mxu1 }
 0x164   : > { %v2927_v5 = vadd.f32 %v2845_v39, %v1342_v33  ;;  %v925_v29 = vadd.f32 %v924_v19, %v737_v49  ;;  %v2930_v36 = vadd.f32 %v1395_v15, %v2853_v9  ;;  %v2933_v35 = vadd.f32 %v1453_v28, %v2858_v24  ;;  %v970_v19 = vld [vmem:[%s2288_s13 + $0x30] sm:$0xff] }
 0x165   : > { %v1166_v60 = vunpack.c.l.bf16 %v1025_v12  ;;  %v1198_v1 = vunpack.c.l.bf16 %v1041_v6  ;;  %v2936_v56 = vadd.f32 %v1511_v13, %v2861_v57  ;;  %v2939_v39 = vadd.f32 %v1569_v45, %v2865_v32  ;;  %v986_v15 = vld [vmem:[%s2288_s13 + $0xb0] sm:$0xff] }
 0x166   : > { %v2942_v49 = vadd.f32 %v1627_v38, %v2868_v58  ;;  %v859_v9 = vadd.f32 %v858_v27, %v2473_v30  ;;  %v2945_v23 = vmul.f32 %v1070_v52, %v958_v3  ;;  %v2947_v24 = vmul.f32 %v1102_v37, %v958_v3  ;;  %v1002_v57 = vld [vmem:[%s2288_s13 + $0x130] sm:$0xff] }
 0x167   : > { %v2949_v4 = vmul.f32 %v1134_v16, %v958_v3  ;;  %v1071_v33 = vunpack.c.h.bf16 %v2893_v48  ;;  %v959_v28 = vmax.f32 %v925_v29, 0.0  ;;  %v1103_v13 = vunpack.c.h.bf16 %v993_v22  ;;  %v1018_v45 = vld [vmem:[%s2288_s13 + $0x1b0] sm:$0xff] }
 0x168   : > { %3277 = vst [vmem:[#allocation36_spill] sm:$0xff] %v2945_v23  ;;  %v1135_v32 = vunpack.c.h.bf16 %v1009_v26  ;;  %v908_v58 = vadd.f32 %v907_v42, %v2473_v30  ;;  %v2958_v38 = vmul.f32 %v1166_v60, %v958_v3  ;;  %v2960_v52 = vmul.f32 %v1198_v1, %v958_v3  ;;  %v878_v3 = vpop.f32.mrf.mxu2 }
 0x169   : > { %3278 = vst [vmem:[#allocation37_spill] sm:$0xff] %v2947_v24  ;;  %v1167_v37 = vunpack.c.h.bf16 %v1025_v12  ;;  %v1199_v27 = vunpack.c.h.bf16 %v1041_v6  ;;  %v944_v16 = vmax.f32 %v859_v9, 0.0  ;;  %v1056_v0 = vunpack.c.l.bf16 %v970_v19 }
 0x16a   : > { %3279 = vst [vmem:[#allocation38_spill] sm:$0xff] %v2949_v4  ;;  %v1088_v21 = vunpack.c.l.bf16 %v986_v15  ;;  %v1120_v48 = vunpack.c.l.bf16 %v1002_v57  ;;  %v1152_v31 = vunpack.c.l.bf16 %v1018_v45  ;;  %v1184_v11 = vunpack.c.l.bf16 %v1034_v54 }
 0x16b   : > { %3280 = vst [vmem:[#allocation39_spill] sm:$0xff] %v2958_v38  ;;  %v945_v4 = vmax.f32 %v908_v58, 0.0  ;;  %v1057_v29 = vunpack.c.h.bf16 %v970_v19  ;;  %v1231_v22 = vmul.f32 %v1071_v33, %v959_v28  ;;  %v1263_v26 = vmul.f32 %v1103_v13, %v959_v28 }
 0x16c   : > { %3281 = vst [vmem:[#allocation40_spill] sm:$0xff] %v2960_v52  ;;  %v1295_v61 = vmul.f32 %v1135_v32, %v959_v28  ;;  %v1089_v24 = vunpack.c.h.bf16 %v986_v15  ;;  %v1327_v23 = vmul.f32 %v1167_v37, %v959_v28  ;;  %v1359_v30 = vmul.f32 %v1199_v27, %v959_v28  ;;  %v742_v52 = vpop.permute.xlu2 %741 }
 0x16d   : > { %v1121_v60 = vunpack.c.h.bf16 %v1002_v57  ;;  %v1153_v42 = vunpack.c.h.bf16 %v1018_v45  ;;  %v1216_v1 = vmul.f32 %v1056_v0, %v944_v16  ;;  %v1185_v12 = vunpack.c.h.bf16 %v1034_v54 }
 0x16e   : > { %v1217_v6 = vmul.f32 %v1057_v29, %v945_v4  ;;  %v1249_v9 = vmul.f32 %v1089_v24, %v945_v4  ;;  %v1248_v38 = vmul.f32 %v1088_v21, %v944_v16  ;;  %v1280_v2 = vmul.f32 %v1120_v48, %v944_v16  ;;  %v2978_v24 = vld [vmem:[%s2288_s13 + $0xf0] sm:$0xff]  ;;  %v860_v29 = vpop.f32.mrf.mxu0 }
 0x16f   : > { %v1312_v58 = vmul.f32 %v1152_v31, %v944_v16  ;;  %v1344_v19 = vmul.f32 %v1184_v11, %v944_v16  ;;  %v2963_v33 = vsel %vm1385_vm2, %v1231_v22, 0.0  ;;  %v2966_v15 = vsel %vm1385_vm2, %v1263_v26, 0.0  ;;  %v2975_v11 = vld [vmem:[%s2288_s13 + $0x70] sm:$0xff] }
 0x170   : > { %3282 = vst [vmem:[#allocation41_spill] sm:$0xff] %v2963_v33  ;;  %v1281_v57 = vmul.f32 %v1121_v60, %v945_v4  ;;  %v879_v28 = vadd.f32 %v878_v3, %v742_v52  ;;  %v2969_v0 = vsel %vm1385_vm2, %v1295_v61, 0.0  ;;  %v2972_v54 = vsel %vm1385_vm2, %v1327_v23, 0.0  ;;  %v2993_v16 = vld [vmem:[%s2288_s13 + $0x170] sm:$0xff]  ;;  %v1019_v3 = vld [vmem:[%s2288_s13 + $0x1b8] sm:$0xff] }
 0x171   : > { %3283 = vst [vmem:[#allocation42_spill] sm:$0xff] %v2966_v15  ;;  %v1313_v21 = vmul.f32 %v1153_v42, %v945_v4  ;;  %v1345_v31 = vmul.f32 %v1185_v12, %v945_v4  ;;  %v2981_v13 = vsel %vm1385_vm2, %v1359_v30, 0.0  ;;  %v1369_v32 = vadd.f32 %v2907_v20, %v1216_v1  ;;  %v2996_v48 = vld [vmem:[%s2288_s13 + $0x1f0] sm:$0xff] }
 0x172   : > { %3284 = vst [vmem:[#allocation43_spill] sm:$0xff] %v2969_v0  ;;  %v1397_v61 = vsel %vm1385_vm2, %v1217_v6, 0.0  ;;  %v1455_v45 = vsel %vm1385_vm2, %v1249_v9, 0.0  ;;  %v1428_v23 = vadd.f32 %v2910_v47, %v1248_v38  ;;  %v1486_v4 = vadd.f32 %v2921_v51, %v1280_v2  ;;  %v2999_v20 = vld [vmem:[%s2288_s13 + $0x270] sm:$0xff]  ;;  %v971_v51 = vld [vmem:[%s2288_s13 + $0x38] sm:$0xff]  ;;  %v927_v9 = vpop.f32.mrf.mxu3 }
 0x173   : > { %3285 = vst [vmem:[#allocation44_spill] sm:$0xff] %v2972_v54  ;;  %v1544_v37 = vadd.f32 %v2924_v17, %v1312_v58  ;;  %v2990_v27 = vadd.f32 %v2927_v5, %v1344_v19  ;;  %v1513_v22 = vsel %vm1385_vm2, %v1281_v57, 0.0  ;;  %v960_v26 = vmax.f32 %v879_v28, 0.0  ;;  %v987_v17 = vld [vmem:[%s2288_s13 + $0xb8] sm:$0xff] }
 0x174   : > { %3286 = vst [vmem:[#allocation45_spill] sm:$0xff] %v2981_v13  ;;  %v1072_v47 = vunpack.c.l.bf16 %v2975_v11  ;;  %v1104_v2 = vunpack.c.l.bf16 %v2978_v24  ;;  %v1003_v38 = vld [vmem:[%s2288_s13 + $0x138] sm:$0xff]  ;;  %v3008_v5 = vadd.f32 %v1397_v61, %v2930_v36  ;;  %v3011_v30 = vadd.f32 %v1455_v45, %v2933_v35  ;;  %v909_v36 = vpop.f32.mrf.mxu1 }
 0x175   : > { %v1571_v60 = vsel %vm1385_vm2, %v1313_v21, 0.0  ;;  %v1629_v42 = vsel %vm1385_vm2, %v1345_v31, 0.0  ;;  %v1136_v1 = vunpack.c.l.bf16 %v2993_v16  ;;  %v1168_v12 = vunpack.c.l.bf16 %v2996_v48  ;;  %v1035_v45 = vld [vmem:[%s2288_s13 + $0x238] sm:$0xff] }
 0x176   : > { %v1200_v6 = vunpack.c.l.bf16 %v2999_v20  ;;  %v861_v58 = vadd.f32 %v860_v29, %v2668_v8  ;;  %v3021_v19 = vadd.f32 %v1513_v22, %v2936_v56  ;;  %v1058_v35 = vunpack.c.l.bf16 %v971_v51 }
 0x177   : > { %v1090_v57 = vunpack.c.l.bf16 %v987_v17  ;;  %v1122_v28 = vunpack.c.l.bf16 %v1003_v38  ;;  %v3024_v21 = vadd.f32 %v1571_v60, %v2939_v39  ;;  %v3027_v31 = vadd.f32 %v1629_v42, %v2942_v49 }
 0x178   : > { %v3029_v61 = vmul.f32 %v1072_v47, %v960_v26  ;;  %v1154_v13 = vunpack.c.l.bf16 %v1019_v3  ;;  %v3032_v54 = vmul.f32 %v1104_v2, %v960_v26  ;;  %v928_v29 = vadd.f32 %v927_v9, %v742_v52 }
 0x179   : > { %v946_v0 = vmax.f32 %v861_v58, 0.0  ;;  %v910_v56 = vadd.f32 %v909_v36, %v2668_v8  ;;  %v3035_v22 = vmul.f32 %v1136_v1, %v960_v26  ;;  %v3037_v15 = vmul.f32 %v1168_v12, %v960_v26 }
 0x17a   : > { %3287 = vst [vmem:[#allocation46_spill] sm:$0xff] %v3029_v61  ;;  %v3039_v33 = vmul.f32 %v1200_v6, %v960_v26  ;;  %v1073_v39 = vunpack.c.h.bf16 %v2975_v11  ;;  %v1186_v49 = vunpack.c.l.bf16 %v1035_v45  ;;  %v1105_v61 = vunpack.c.h.bf16 %v2978_v24 }
 0x17b   : > { %3288 = vst [vmem:[#allocation47_spill] sm:$0xff] %v3032_v54  ;;  %v1218_v60 = vmul.f32 %v1058_v35, %v946_v0  ;;  %v1250_v47 = vmul.f32 %v1090_v57, %v946_v0  ;;  %v1282_v42 = vmul.f32 %v1122_v28, %v946_v0  ;;  %v1314_v2 = vmul.f32 %v1154_v13, %v946_v0 }
 0x17c   : > { %3289 = vst [vmem:[#allocation48_spill] sm:$0xff] %v3037_v15  ;;  %v947_v54 = vmax.f32 %v910_v56, 0.0  ;;  %v1059_v52 = vunpack.c.h.bf16 %v971_v51  ;;  %v961_v9 = vmax.f32 %v928_v29, 0.0  ;;  %v1091_v1 = vunpack.c.h.bf16 %v987_v17 }
 0x17d   : > { %v1370_v58 = vadd.f32 %v1369_v32, %v1218_v60  ;;  %v1429_v8 = vadd.f32 %v1428_v23, %v1250_v47  ;;  %v1487_v36 = vadd.f32 %v1486_v4, %v1282_v42  ;;  %v1545_v12 = vadd.f32 %v1544_v37, %v1314_v2  ;;  %v979_v42 = vld [vmem:[%s2288_s13 + $0x78] sm:$0xff] }
 0x17e   : > { %v1123_v15 = vunpack.c.h.bf16 %v1003_v38  ;;  %v1155_v26 = vunpack.c.h.bf16 %v1019_v3  ;;  %v1137_v6 = vunpack.c.h.bf16 %v2993_v16  ;;  %v1169_v11 = vunpack.c.h.bf16 %v2996_v48 }
 0x17f   : > { %v1346_v35 = vmul.f32 %v1186_v49, %v946_v0  ;;  %v1187_v57 = vunpack.c.h.bf16 %v1035_v45  ;;  %v1371_v28 = vadd.f32 %v1370_v58, %v2537_v46  ;;  %v1430_v24 = vadd.f32 %v1429_v8, %v2541_v53  ;;  %v1011_v58 = vld [vmem:[%s2288_s13 + $0x178] sm:$0xff] }
 0x180   : > { %v1219_v13 = vmul.f32 %v1059_v52, %v947_v54  ;;  %v1251_v51 = vmul.f32 %v1091_v1, %v947_v54  ;;  %v1201_v32 = vunpack.c.h.bf16 %v2999_v20  ;;  %v1233_v23 = vmul.f32 %v1073_v39, %v961_v9  ;;  %v747_v39 = vpop.permute.xlu0 %746  ;;  %v3290_v52 = vld [vmem:[#allocation7_spill] sm:$0xff] }
 0x181   : > { %v1265_v17 = vmul.f32 %v1105_v61, %v961_v9  ;;  %v1283_v4 = vmul.f32 %v1123_v15, %v947_v54  ;;  %v1488_v37 = vadd.f32 %v1487_v36, %v2551_v14  ;;  %v1546_v38 = vadd.f32 %v1545_v12, %v2578_v43  ;;  %v3291_v36 = vld [vmem:[#allocation12_spill] sm:$0xff]  ;;  %v3292_v12 = vld [vmem:[#allocation3_spill] sm:$0xff] }
 0x182   : > { %v1315_v16 = vmul.f32 %v1155_v26, %v947_v54  ;;  %v1347_v3 = vmul.f32 %v1187_v57, %v947_v54  ;;  %v1297_v48 = vmul.f32 %v1137_v6, %v961_v9  ;;  %v1329_v0 = vmul.f32 %v1169_v11, %v961_v9  ;;  %v3092_v6 = vld [vmem:[%s2288_s13 + $0x1f8] sm:$0xff]  ;;  %v3295_v57 = vld [vmem:[#allocation4_spill] sm:$0xff] }
 0x183   : > { %v1603_v45 = vadd.f32 %v2990_v27, %v1346_v35  ;;  %v1399_v46 = vsel %vm1385_vm2, %v1219_v13, 0.0  ;;  %v1372_v53 = vadd.f32 %v1371_v28, %v2621_v34  ;;  %v1431_v29 = vadd.f32 %v1430_v24, %v2625_v10  ;;  %v880_v27 = vpop.f32.mrf.mxu2  ;;  %v3293_v11 = vld [vmem:[#allocation6_spill] sm:$0xff]  ;;  %v929_v13 = vpop.f32.mrf.mxu3 }
 0x184   : > { %v1400_v20 = vadd.f32 %v1399_v46, %v3008_v5  ;;  %v1457_v15 = vsel %vm1385_vm2, %v1251_v51, 0.0  ;;  %v1515_v43 = vsel %vm1385_vm2, %v1283_v4, 0.0  ;;  %v1573_v54 = vsel %vm1385_vm2, %v1315_v16, 0.0  ;;  %v3296_v51 = vld [vmem:[#allocation5_spill] sm:$0xff]  ;;  %v3297_v4 = vld [vmem:[#allocation14_spill] sm:$0xff] }
 0x185   : > { %v1458_v14 = vadd.f32 %v1457_v15, %v3011_v30  ;;  %v1631_v61 = vsel %vm1385_vm2, %v1347_v3, 0.0  ;;  %v1489_v56 = vadd.f32 %v1488_v37, %v2629_v41  ;;  %v1547_v34 = vadd.f32 %v1546_v38, %v2636_v63  ;;  %v3298_v16 = vld [vmem:[#allocation18_spill] sm:$0xff] }
 0x186   : > { %v1402_v10 = vadd.f32 %v2593_v59, %v1400_v20  ;;  %v1516_v5 = vadd.f32 %v1515_v43, %v3021_v19  ;;  %v3064_v30 = vmul.f32 %v1201_v32, %v961_v9  ;;  %v1604_v49 = vadd.f32 %v1603_v45, %v2590_v7  ;;  %v995_v9 = vld [vmem:[%s2288_s13 + $0xf8] sm:$0xff]  ;;  %v3300_v45 = vld [vmem:[#allocation9_spill] sm:$0xff]  ;;  %v3303_v43 = vld [vmem:[#allocation15_spill] sm:$0xff] }
 0x187   : > { %v1460_v60 = vadd.f32 %v2596_v25, %v1458_v14  ;;  %v1574_v47 = vadd.f32 %v1573_v54, %v3024_v21  ;;  %v3070_v41 = vsel %vm1385_vm2, %v1233_v23, 0.0  ;;  %v3073_v63 = vsel %vm1385_vm2, %v1265_v17, 0.0  ;;  %v3302_v20 = vld [vmem:[#allocation22_spill] sm:$0xff] }
 0x188   : > { %v1632_v59 = vadd.f32 %v1631_v61, %v3027_v31  ;;  %v881_v19 = vadd.f32 %v880_v27, %v747_v39  ;;  %v3078_v2 = vsel %vm1385_vm2, %v1297_v48, 0.0  ;;  %v1373_v7 = vadd.f32 %v1372_v53, %v2771_v62  ;;  %v3294_v62 = vld [vmem:[#allocation8_spill] sm:$0xff]  ;;  %v3299_v48 = vld [vmem:[#allocation19_spill] sm:$0xff]  ;;  %v3301_v53 = vld [vmem:[#allocation21_spill] sm:$0xff] }
 0x189   : > { %v1432_v25 = vadd.f32 %v1431_v29, %v2773_v44  ;;  %v1404_v21 = vadd.f32 %v3290_v52, %v1402_v10  ;;  %v3086_v8 = vsel %vm1385_vm2, %v1329_v0, 0.0  ;;  %v1490_v1 = vadd.f32 %v1489_v56, %v2775_v18  ;;  %v3304_v61 = vld [vmem:[#allocation10_spill] sm:$0xff]  ;;  %v3308_v52 = vld [vmem:[#allocation24_spill] sm:$0xff] }
 0x18a   : > { %v1548_v31 = vadd.f32 %v1547_v34, %v3291_v36  ;;  %v1518_v26 = vadd.f32 %v3292_v12, %v1516_v5  ;;  %v3095_v35 = vadd.f32 %v1604_v49, %v3293_v11  ;;  %v1462_v44 = vadd.f32 %v3294_v62, %v1460_v60  ;;  %v3305_v49 = vld [vmem:[#allocation29_spill] sm:$0xff]  ;;  %v3311_v12 = vld [vmem:[#allocation39_spill] sm:$0xff]  ;;  %v3313_v62 = vld [vmem:[#allocation46_spill] sm:$0xff] }
 0x18b   : > { %v1576_v28 = vadd.f32 %v3295_v57, %v1574_v47  ;;  %v1074_v24 = vunpack.c.l.bf16 %v979_v42  ;;  %v1634_v32 = vadd.f32 %v3296_v51, %v1632_v59  ;;  %v3100_v23 = vmax.f32 %v881_v19, 0.0  ;;  %v3306_v59 = vld [vmem:[#allocation36_spill] sm:$0xff]  ;;  %v3314_v57 = vld [vmem:[#allocation47_spill] sm:$0xff] }
 0x18c   : > { %v1106_v18 = vunpack.c.l.bf16 %v995_v9  ;;  %v1138_v17 = vunpack.c.l.bf16 %v1011_v58  ;;  %v1406_v37 = vadd.f32 %v3297_v4, %v1404_v21  ;;  %v1170_v38 = vunpack.c.l.bf16 %v3092_v6  ;;  %v3315_v4 = vld [vmem:[#allocation31_spill] sm:$0xff] }
 0x18d   : > { %v1374_v3 = vadd.f32 %v1373_v7, %v3298_v16  ;;  %v1433_v0 = vadd.f32 %v1432_v25, %v3299_v48  ;;  %v1520_v46 = vadd.f32 %v3300_v45, %v1518_v26  ;;  %v1491_v29 = vadd.f32 %v1490_v1, %v3301_v53  ;;  %v3307_v7 = vld [vmem:[#allocation37_spill] sm:$0xff]  ;;  %v3309_v1 = vld [vmem:[#allocation16_spill] sm:$0xff] }
 0x18e   : > { %v1549_v15 = vadd.f32 %v1548_v31, %v3302_v20  ;;  %v930_v14 = vadd.f32 %v929_v13, %v747_v39  ;;  %v1464_v54 = vadd.f32 %v3303_v43, %v1462_v44  ;;  %v1578_v27 = vadd.f32 %v3304_v61, %v1576_v28  ;;  %v3316_v48 = vld [vmem:[#allocation25_spill] sm:$0xff] }
 0x18f   : > { %v1375_v56 = vadd.f32 %v1374_v3, %v2870_v55  ;;  %v1434_v34 = vadd.f32 %v1433_v0, %v2874_v40  ;;  %v1234_v10 = vmul.f32 %v1074_v24, %v3100_v23  ;;  %v1492_v5 = vadd.f32 %v1491_v29, %v2878_v50  ;;  %v3310_v40 = vld [vmem:[#allocation38_spill] sm:$0xff]  ;;  %v3312_v50 = vld [vmem:[#allocation17_spill] sm:$0xff] }
 0x190   : > { %v1550_v60 = vadd.f32 %v1549_v15, %v3305_v49  ;;  %v1075_v47 = vunpack.c.h.bf16 %v979_v42  ;;  %v3118_v39 = vmax.f32 %v930_v14, 0.0  ;;  %v1408_v21 = vadd.f32 %v3308_v52, %v1406_v37  ;;  %v3318_v29 = vld [vmem:[#allocation41_spill] sm:$0xff]  ;;  %v3320_v14 = vld [vmem:[#allocation26_spill] sm:$0xff] }
 0x191   : > { %v1376_v19 = vadd.f32 %v1375_v56, %v3306_v59  ;;  %v1435_v25 = vadd.f32 %v1434_v34, %v3307_v7  ;;  %v1522_v36 = vadd.f32 %v3309_v1, %v1520_v46  ;;  %v1266_v55 = vmul.f32 %v1106_v18, %v3100_v23  ;;  %v3322_v49 = vld [vmem:[#allocation33_spill] sm:$0xff] }
 0x192   : > { %v1493_v31 = vadd.f32 %v1492_v5, %v3310_v40  ;;  %v1551_v26 = vadd.f32 %v1550_v60, %v3311_v12  ;;  %v1580_v11 = vadd.f32 %v3312_v50, %v1578_v27  ;;  %v1298_v42 = vmul.f32 %v1138_v17, %v3100_v23  ;;  %v3317_v17 = vld [vmem:[#allocation48_spill] sm:$0xff]  ;;  %v3326_v12 = vld [vmem:[#allocation34_spill] sm:$0xff] }
 0x193   : > { %v1377_v44 = vadd.f32 %v1376_v19, %v3313_v62  ;;  %v1436_v28 = vadd.f32 %v1435_v25, %v3314_v57  ;;  %v1107_v13 = vunpack.c.h.bf16 %v995_v9  ;;  %v1139_v51 = vunpack.c.h.bf16 %v1011_v58  ;;  %v3319_v9 = vld [vmem:[#allocation32_spill] sm:$0xff]  ;;  %v3323_v19 = vld [vmem:[#allocation27_spill] sm:$0xff] }
 0x194   : > { %v1494_v24 = vadd.f32 %v1493_v31, %v3035_v22  ;;  %v1410_v37 = vadd.f32 %v3315_v4, %v1408_v21  ;;  %v1235_v3 = vmul.f32 %v1075_v47, %v3118_v39  ;;  %v1466_v0 = vadd.f32 %v3316_v48, %v1464_v54  ;;  %v3324_v25 = vld [vmem:[#allocation11_spill] sm:$0xff]  ;;  %v3329_v4 = vld [vmem:[#allocation20_spill] sm:$0xff] }
 0x195   : > { %v1378_v16 = vadd.f32 %v1377_v44, %v1234_v10  ;;  %v1437_v18 = vadd.f32 %v1436_v28, %v1266_v55  ;;  %v1330_v45 = vmul.f32 %v1170_v38, %v3100_v23  ;;  %v1552_v53 = vadd.f32 %v1551_v26, %v3317_v17  ;;  %v3321_v10 = vld [vmem:[#allocation42_spill] sm:$0xff] }
 0x196   : > { %v1495_v46 = vadd.f32 %v1494_v24, %v1298_v42  ;;  %v1412_v20 = vadd.f32 %v3318_v29, %v1410_v37  ;;  %v1171_v22 = vunpack.c.h.bf16 %v3092_v6  ;;  %v1468_v58 = vadd.f32 %v3319_v9, %v1466_v0  ;;  %v1043_v44 = vld [vmem:[%s2288_s13 + $0x278] sm:$0xff]  ;;  %v3327_v24 = vld [vmem:[#allocation44_spill] sm:$0xff] }
 0x197   : > { %v1379_v15 = vrot.slane %v1378_v16, 4  ;;  %v1524_v43 = vadd.f32 %v3320_v14, %v1522_v36  ;;  %v1438_v61 = vrot.slane %v1437_v18, 4  ;;  %v1267_v27 = vmul.f32 %v1107_v13, %v3118_v39  ;;  %v3328_v13 = vld [vmem:[#allocation13_spill] sm:$0xff] }
 0x198   : > { %v1299_v56 = vmul.f32 %v1139_v51, %v3118_v39  ;;  %v1414_v54 = vadd.f32 %v3070_v41, %v1412_v20  ;;  %v1496_v38 = vrot.slane %v1495_v46, 4  ;;  %v1415_v34 = vsel %vm1385_vm2, %v1235_v3, 0.0  ;;  %v3325_v41 = vld [vmem:[#allocation43_spill] sm:$0xff] }
 0x199   : > { %v1470_v5 = vadd.f32 %v3321_v10, %v1468_v58  ;;  %v1526_v60 = vadd.f32 %v3322_v49, %v1524_v43  ;;  %v1380_v47 = vadd.f32 %v1379_v15, %v1378_v16  ;;  %v1553_v6 = vadd.f32 %v1552_v53, %v1330_v45  ;;  %v3330_v58 = vld [vmem:[#allocation23_spill] sm:$0xff]  ;;  %v3331_v43 = vld [vmem:[#allocation28_spill] sm:$0xff] }
 0x19a   : > { %v1416_v59 = vadd.f32 %v1415_v34, %v1414_v54  ;;  %v1582_v7 = vadd.f32 %v3323_v19, %v1580_v11  ;;  %v1636_v52 = vadd.f32 %v3324_v25, %v1634_v32  ;;  %v1331_v21 = vmul.f32 %v1171_v22, %v3118_v39  ;;  %v3332_v34 = vld [vmem:[#allocation30_spill] sm:$0xff]  ;;  %v3334_v25 = vld [vmem:[#allocation40_spill] sm:$0xff] }
 0x19b   : > { %v1472_v1 = vadd.f32 %v3073_v63, %v1470_v5  ;;  %v1528_v36 = vadd.f32 %v3325_v41, %v1526_v60  ;;  %v1439_v55 = vadd.f32 %v1438_v61, %v1437_v18  ;;  %v1473_v31 = vsel %vm1385_vm2, %v1267_v27, 0.0  ;;  %v3333_v5 = vld [vmem:[#allocation35_spill] sm:$0xff] }
 0x19c   : > { %v1417_v40 = vrot.slane %v1416_v59, 4  ;;  %v1584_v26 = vadd.f32 %v3326_v12, %v1582_v7  ;;  %v1531_v62 = vsel %vm1385_vm2, %v1299_v56, 0.0  ;;  %v1497_v11 = vadd.f32 %v1496_v38, %v1495_v46 }
 0x19d   : > { %v1474_v50 = vadd.f32 %v1473_v31, %v1472_v1  ;;  %v1530_v42 = vadd.f32 %v3078_v2, %v1528_v36  ;;  %v1381_v57 = vrot.slane %v1380_v47, 2  ;;  %v1554_v28 = vrot.slane %v1553_v6, 4 }
 0x19e   : > { %v1418_v32 = vadd.f32 %v1417_v40, %v1416_v59  ;;  %v1586_v63 = vadd.f32 %v3327_v24, %v1584_v26  ;;  %v1606_v51 = vadd.f32 %v3095_v35, %v3328_v13  ;;  %v1638_v37 = vadd.f32 %v3329_v4, %v1636_v52 }
 0x19f   : > { %v1475_v16 = vrot.slane %v1474_v50, 4  ;;  %v1532_v18 = vadd.f32 %v1531_v62, %v1530_v42  ;;  %v1645_v3 = vsel %vm1385_vm2, %v3064_v30, 0.0  ;;  %v1440_v48 = vrot.slane %v1439_v55, 2 }
 0x1a0   : > { %v1419_v2 = vrot.slane %v1418_v32, 2  ;;  %v1588_v0 = vadd.f32 %v3086_v8, %v1586_v63  ;;  %v1203_v45 = vunpack.c.h.bf16 %v1043_v44  ;;  %v1589_v17 = vsel %vm1385_vm2, %v1331_v21, 0.0  ;;  %v3335_v21 = vld [vmem:[#allocation45_spill] sm:$0xff] }
 0x1a1   : > { %v1476_v46 = vadd.f32 %v1475_v16, %v1474_v50  ;;  %v1533_v53 = vrot.slane %v1532_v18, 4  ;;  %v1382_v29 = vadd.f32 %v1381_v57, %v1380_v47  ;;  %v1498_v20 = vrot.slane %v1497_v11, 2 }
 0x1a2   : > { %v1555_v15 = vadd.f32 %v1554_v28, %v1553_v6  ;;  %v1590_v35 = vadd.f32 %v1589_v17, %v1588_v0  ;;  %v1607_v14 = vadd.f32 %v1606_v51, %v3330_v58  ;;  %v1640_v61 = vadd.f32 %v3331_v43, %v1638_v37 }
 0x1a3   : > { %v1477_v22 = vrot.slane %v1476_v46, 2  ;;  %v1534_v9 = vadd.f32 %v1533_v53, %v1532_v18  ;;  %v1202_v30 = vunpack.c.l.bf16 %v1043_v44  ;;  %v1420_v27 = vadd.f32 %v1419_v2, %v1418_v32 }
 0x1a4   : > { %v1441_v56 = vadd.f32 %v1440_v48, %v1439_v55  ;;  %v1591_v54 = vrot.slane %v1590_v35, 4  ;;  %v1608_v10 = vadd.f32 %v1607_v14, %v3332_v34  ;;  %v1642_v49 = vadd.f32 %v3333_v5, %v1640_v61 }
 0x1a5   : > { %v1478_v8 = vadd.f32 %v1477_v22, %v1476_v46  ;;  %v1535_v38 = vrot.slane %v1534_v9, 2  ;;  %v1363_v60 = vmul.f32 %v1203_v45, %v3118_v39  ;;  %v1499_v47 = vadd.f32 %v1498_v20, %v1497_v11 }
 0x1a6   : > { %v1556_v6 = vrot.slane %v1555_v15, 2  ;;  %v1592_v59 = vadd.f32 %v1591_v54, %v1590_v35  ;;  %v1383_v19 = vrot.slane %v1382_v29, 1  ;;  %v1609_v52 = vadd.f32 %v1608_v10, %v3334_v25  ;;  %v1686_v54 = vld [vmem:[%s2276_s28] sm:$0x1f] }
 0x1a7   : > { %v1536_v7 = vadd.f32 %v1535_v38, %v1534_v9  ;;  %v1644_v1 = vadd.f32 %v3335_v21, %v1642_v49  ;;  %v1421_v41 = vrot.slane %v1420_v27, 1  ;;  %v1442_v36 = vrot.slane %v1441_v56, 1 }
 0x1a8   : > { %v1479_v55 = vrot.slane %v1478_v8, 1  ;;  %v1593_v40 = vrot.slane %v1592_v59, 2  ;;  %v1362_v31 = vmul.f32 %v1202_v30, %v3100_v23  ;;  %v1610_v12 = vadd.f32 %v1609_v52, %v3039_v33 }
 0x1a9   : > { %v1646_v26 = vadd.f32 %v1645_v3, %v1644_v1  ;;  %v1500_v50 = vrot.slane %v1499_v47, 1  ;;  %v1557_v39 = vadd.f32 %v1556_v6, %v1555_v15  ;;  %v1647_v42 = vsel %vm1385_vm2, %v1363_v60, 0.0 }
 0x1aa   : > { %v1384_v62 = vadd.f32 %v1383_v19, %v1382_v29  ;;  %v1537_v11 = vrot.slane %v1536_v7, 1  ;;  %v1611_v44 = vadd.f32 %v1610_v12, %v1362_v31  ;;  %v1422_v57 = vadd.f32 %v1421_v41, %v1420_v27 }
 0x1ab   : > { %v1648_v32 = vadd.f32 %v1647_v42, %v1646_v26  ;;  %v1443_v28 = vadd.f32 %v1442_v36, %v1441_v56  ;;  %v1480_v24 = vadd.f32 %v1479_v55, %v1478_v8  ;;  %v1594_v63 = vadd.f32 %v1593_v40, %v1592_v59 }
 0x1ac   : > { %v1612_v13 = vrot.slane %v1611_v44, 4  ;;  %v1501_v4 = vadd.f32 %v1500_v50, %v1499_v47  ;;  %v1538_v23 = vadd.f32 %v1537_v11, %v1536_v7  ;;  %v1558_v37 = vrot.slane %v1557_v39, 1 }
 0x1ad   : > { %v1649_v51 = vrot.slane %v1648_v32, 4  ;;  %v1595_v18 = vrot.slane %v1594_v63, 1  ;;  %v1666_v3 = vsel %vm1665_vm3, %v1443_v28, %v1384_v62  ;;  %v1673_v2 = vsel %vm1665_vm3, %v1480_v24, %v1422_v57 }
 0x1ae   : > { %v1613_v33 = vadd.f32 %v1612_v13, %v1611_v44  ;;  %v1668_v17 = vsel %vm1667_vm4, %v1501_v4, %v1666_v3  ;;  %v1674_v53 = vsel %vm1667_vm4, %v1538_v23, %v1673_v2  ;;  %v1559_v29 = vadd.f32 %v1558_v37, %v1557_v39 }
 0x1af   : > { %v1650_v16 = vadd.f32 %v1649_v51, %v1648_v32  ;;  %v1596_v20 = vadd.f32 %v1595_v18, %v1594_v63 }
 0x1b0   : > { %v1614_v48 = vrot.slane %v1613_v33, 2  ;;  %v1670_v22 = vsel %vm1669_vm5, %v1559_v29, %v1668_v17 }
 0x1b1   : > { %v1651_v0 = vrot.slane %v1650_v16, 2  ;;  %v1675_v9 = vsel %vm1669_vm5, %v1596_v20, %v1674_v53 }
 0x1b2   : > { %v1615_v45 = vadd.f32 %v1614_v48, %v1613_v33 }
 0x1b3   : > { %v1652_v46 = vadd.f32 %v1651_v0, %v1650_v16 }
 0x1b4   : > { %v1616_v15 = vrot.slane %v1615_v45, 1 }
 0x1b5   : > { %v1653_v35 = vrot.slane %v1652_v46, 1 }
 0x1b6   : > { %v1617_v58 = vadd.f32 %v1616_v15, %v1615_v45 }
 0x1b7   : > { %v1654_v14 = vadd.f32 %v1653_v35, %v1652_v46 }
 0x1b8   : > { %v1672_v43 = vsel %vm1671_vm6, %v1617_v58, %v1670_v22 }
 0x1b9   : > { %v1676_v61 = vsel %vm1671_vm6, %v1654_v14, %v1675_v9  ;;  %v1680_v30 = vsel %vm1679_vm7, %v1672_v43, 0.0 }
 0x1ba   : > { %v1682_v27 = vsel %vm1681_vm8, %v1676_v61, 0.0 }
 0x1bb   : > { %v1683_v56 = vadd.f32 %v1682_v27, %v1680_v30 }
 0x1bd   : > { %1684 = vadd.xlane.f32.xlu1 %v1683_v56 }
 0x230   : > { %v1685_v8 = vpop.xlane.xlu1 %1684 }
 0x231   : > { %v1687_v38 = vadd.f32 %v1686_v54, %v1685_v8 }
 0x233   : > { %1689 = vst.msk [vmem:[%s2276_s28] sm:$0x1f] %vm1688_vm9, %v1687_v38 }
 0x234 PF: > { %s14_s21 = sadd.s32 1, %s2014_s21   ;;  %s3336_s15 = smov %s1994_s16 }
 0x235   : > { %p11_p13 = scmp.ge.s32.totalorder %s14_s21, 10   ;;  %s3337_s16 = smov %s2092_s26 }
 0x236   : > { %s3338_s17 = smov %s2006_s19  ;;  %s3339_s18 = smov %s2010_s20 }
 0x237   : > { %s3340_s19 = smov %s3343_s22  ;;  %s3341_s20 = smov %s3347_s23 }
 0x238   :  { %13 = sbr.rel (!%p11_p13) target bundleno = 4 (0x4), region = 122 }

</bundles_post_ra>
